<compile_context>
chip_gen: v7x
topology: tpu7x:2x2x1
jax: 0.10.0
libtpu: 0.0.40
codegen_flags: <defaults>
</compile_context>

<pallas_src>
import numpy as np

import jax
import jax.numpy as jnp
from jax.experimental import pallas as pl
from jax.experimental.pallas import tpu as pltpu

EPS = 1e-5
NEG_SLOPE = 0.01  # nn.LeakyReLU() default


# ----------------------------------------------------------------------------
# Wrapper-side weight repacking (pure layout transforms; run ONCE per weight
# update -- hoisted out of the per-call forward jit).
# ----------------------------------------------------------------------------
def _conv_toeplitz(w_hwio, W):
    """(5,5,Ci,Co) HWIO -> (5*W*Ci, W*Co) Toeplitz slab.

    Row index = dy*W*Ci + xs*Ci + ci over the 5 H-taps x UNPADDED input
    columns; column index = xo*Co + co over UNPADDED output columns.  Taps
    that would read outside [0, W) are zeroed, which realizes the conv's zero
    W-padding for free (no padded-W layout anywhere)."""
    _, _, Ci, Co = w_hwio.shape
    xs = np.arange(W)[:, None]          # source x (unpadded)
    xo = np.arange(W)[None, :]          # output x
    dx = xs - xo + 2                    # kernel tap index along W
    valid = jnp.asarray((dx >= 0) & (dx <= 4), w_hwio.dtype)
    t = w_hwio[:, np.clip(dx, 0, 4), :, :] * valid[None, :, :, None, None]
    # (dy, xs, xo, Ci, Co) -> (dy, xs, Ci, xo, Co) -> (5*W*Ci, W*Co)
    t = jnp.transpose(t, (0, 1, 3, 2, 4))
    return t.reshape(5 * W * Ci, W * Co)


def _chan_selectors(C, W):
    """Channel<->lane selectors for the dense flat (.., W*C) layout.

    E (C, W*C): broadcasts a per-channel row vector onto lanes.
    S = E.T (W*C, C): reduces lanes back to per-channel sums."""
    e = jnp.tile(jnp.eye(C, dtype=jnp.float32), (1, W))
    return e, jnp.transpose(e)


def prepare_params(w1, gamma1, beta1, w2, gamma2, beta2, W,
                   compute_dtype=jnp.float32):
    """Repack weights for the kernel (call once per weight update).

    compute_dtype=jnp.bfloat16 stores the Toeplitz slabs in bf16 (native MXU
    dtype on v6e/v7x); BN statistics/affine stay f32."""
    Cmid = w1.shape[-1]
    Cout = w2.shape[-1]
    t1 = _conv_toeplitz(w1, W).astype(compute_dtype)     # (5*W*Cin,  W*Cmid)
    t2 = _conv_toeplitz(w2, W).astype(compute_dtype)     # (5*W*Cmid, W*Cout)
    e1, s1 = _chan_selectors(Cmid, W)
    e2, s2 = _chan_selectors(Cout, W)
    # Per-lane gamma/beta (lane = x*C + c): the BN epilogue never needs a
    # separate broadcast matmul for the static affine part.
    g1l = jnp.tile(gamma1.astype(jnp.float32), W).reshape(1, W * Cmid)
    b1l = jnp.tile(beta1.astype(jnp.float32), W).reshape(1, W * Cmid)
    g2l = jnp.tile(gamma2.astype(jnp.float32), W).reshape(1, W * Cout)
    b2l = jnp.tile(beta2.astype(jnp.float32), W).reshape(1, W * Cout)
    return dict(t1=t1, t2=t2, e1=e1, s1=s1, e2=e2, s2=s2,
                g1l=g1l, b1l=b1l, g2l=g2l, b2l=b2l)


# ----------------------------------------------------------------------------
# Kernel
# ----------------------------------------------------------------------------
def double_conv_kernel(x_ref, t1_ref, t2_ref, g1_ref, b1_ref, g2_ref, b2_ref,
                       e1_ref, s1_ref, e2_ref, s2_ref,
                       o_ref, lhs1_ref, lhs2_ref):
    # x_ref:    (N, H, W*Cin)        input rows, lane axis = W*Cin
    # t1_ref:   (5*W*Cin,  W*Cmid)   conv1 Toeplitz slab (5 dy taps folded on K)
    # t2_ref:   (5*W*Cmid, W*Cout)   conv2 Toeplitz slab
    # g*/b*:    (1, W*C)             per-lane BN affine (gamma/beta pre-tiled)
    # e*/s*:    (C, W*C) / (W*C, C)  channel<->lane selectors
    # o_ref:    (N*H, W*Cout)        lane-dense output slab
    # lhs1_ref: (N, H, 5*W*Cin)      scratch: dy-banded conv1 LHS (f32)
    # lhs2_ref: (N, H, 5*W*Cmid)     scratch: dy-banded conv2 LHS (f32)
    N, H, WC = x_ref.shape
    L1 = t1_ref.shape[-1]           # W*Cmid
    L2 = t2_ref.shape[-1]           # W*Cout
    Cout = e2_ref.shape[0]
    W = L2 // Cout
    inv_cnt = 1.0 / float(N * H * W)
    mxu_dtype = t1_ref.dtype

    def lrelu(v):
        return jnp.maximum(v, NEG_SLOPE * v)

    def bn_scale_shift(act, s_sel_ref, e_sel_ref, gl_ref, bl_ref):
        # Single-pass training-mode batch stats, fully lane-dense: ONE
        # (2,L)@(L,C) reduce matmul and ONE (2,C)@(C,L) broadcast matmul.
        L = act.shape[-1]
        colsum = jnp.sum(act, axis=0, keepdims=True)            # (1, L)
        colsq = jnp.sum(act * act, axis=0, keepdims=True)       # (1, L)
        rid = jax.lax.broadcasted_iota(jnp.int32, (2, L), 0)
        stats = jnp.where(rid == 0, colsum, colsq)              # (2, L)
        red = jnp.dot(stats, s_sel_ref[...],
                      preferred_element_type=jnp.float32) * inv_cnt   # (2, C)
        lane = jnp.dot(red, e_sel_ref[...],
                       preferred_element_type=jnp.float32)            # (2, L)
        mean_l = lane[0:1, :]
        # Clamp: single-pass E[x^2]-E[x]^2 can go slightly negative.
        var_l = jnp.maximum(lane[1:2, :] - mean_l * mean_l, 0.0)
        scale_l = gl_ref[...] * jax.lax.rsqrt(var_l + EPS)      # (1, L)
        shift_l = bl_ref[...] - mean_l * scale_l
        return scale_l, shift_l

    def build_bands(dst_ref, src_rows, L):
        # Band dy (lanes [dy*L, (dy+1)*L)) of output row y holds source row
        # y+dy-2; only the 2-row H halo is zeroed (the zero W-padding lives in
        # the Toeplitz columns, so there is no W halo anywhere).
        for dy in range(5):
            lo = max(0, 2 - dy)
            hi = min(H, H + 2 - dy)
            if lo > 0:
                dst_ref[:, :lo, dy * L:(dy + 1) * L] = jnp.zeros(
                    (N, lo, L), dst_ref.dtype)
            if hi < H:
                dst_ref[:, hi:, dy * L:(dy + 1) * L] = jnp.zeros(
                    (N, H - hi, L), dst_ref.dtype)
            dst_ref[:, lo:hi, dy * L:(dy + 1) * L] = src_rows(lo + dy - 2,
                                                              hi + dy - 2)

    # ---- conv1: ONE (N*H, 5*W*Cin) @ (5*W*Cin, W*Cmid) MXU push ----
    build_bands(lhs1_ref, lambda a, b: x_ref[:, a:b, :], WC)
    lhs1 = lhs1_ref[...].reshape(N * H, 5 * WC).astype(mxu_dtype)
    acc1 = jnp.dot(lhs1, t1_ref[...], preferred_element_type=jnp.float32)

    # LeakyReLU -> BatchNorm (module order), fused epilogue in f32.
    acc1 = lrelu(acc1)
    sc1, sh1 = bn_scale_shift(acc1, s1_ref, e1_ref, g1_ref, b1_ref)
    mid = (acc1 * sc1 + sh1).reshape(N, H, L1)

    # ---- conv2: ONE (N*H, 5*W*Cmid) @ (5*W*Cmid, W*Cout) MXU push ----
    build_bands(lhs2_ref, lambda a, b: mid[:, a:b, :], L1)
    lhs2 = lhs2_ref[...].reshape(N * H, 5 * L1).astype(mxu_dtype)
    acc2 = jnp.dot(lhs2, t2_ref[...], preferred_element_type=jnp.float32)

    acc2 = lrelu(acc2)
    sc2, sh2 = bn_scale_shift(acc2, s2_ref, e2_ref, g2_ref, b2_ref)
    o_ref[...] = acc2 * sc2 + sh2   # (N*H, W*Cout): unmasked full-lane store


# ----------------------------------------------------------------------------
# Forward wrapper (jitted; weight repacking is NOT in here)
# ----------------------------------------------------------------------------
@jax.jit
def double_conv_apply(x_nchw, params):
    """x_nchw: (N, Cin, H, W) f32.  Returns (N, Cout, H, W) f32."""
    N, Cin, H, W = x_nchw.shape
    Cmid = params["e1"].shape[0]
    Cout = params["e2"].shape[0]
    L1 = W * Cmid
    L2 = W * Cout

    # TODO(synk): if the surrounding model can produce/consume the lane-dense
    # NHWC-flat layout directly, drop these two transposes (each is a full
    # activation HBM round trip at scale).
    x_rows = jnp.transpose(x_nchw, (0, 2, 3, 1)).reshape(N, H, W * Cin)

    out_flat = pl.pallas_call(
        double_conv_kernel,
        out_shape=jax.ShapeDtypeStruct((N * H, L2), jnp.float32),
        in_specs=[pl.BlockSpec(memory_space=pltpu.MemorySpace.VMEM)] * 11,
        out_specs=pl.BlockSpec(memory_space=pltpu.MemorySpace.VMEM),
        scratch_shapes=[
            pltpu.VMEM((N, H, 5 * W * Cin), jnp.float32),   # dy-banded conv1 LHS
            pltpu.VMEM((N, H, 5 * L1), jnp.float32),        # dy-banded conv2 LHS
        ],
        compiler_params=pltpu.CompilerParams(
            vmem_limit_bytes=32 * 1024 * 1024),
    )(x_rows, params["t1"], params["t2"],
      params["g1l"], params["b1l"], params["g2l"], params["b2l"],
      params["e1"], params["s1"], params["e2"], params["s2"])

    out = out_flat.reshape(N, H, W, Cout)      # lane index = x*Cout + co
    return jnp.transpose(out, (0, 3, 1, 2))    # back to NCHW


# ----------------------------------------------------------------------------
# Plain-JAX reference of the same forward pass (for verification).
# ----------------------------------------------------------------------------
def _reference(x_nchw, w1, gamma1, beta1, w2, gamma2, beta2):
    x = jnp.transpose(x_nchw, (0, 2, 3, 1))
    dn = ('NHWC', 'HWIO', 'NHWC')

    def block(h, w, g, b):
        h = jax.lax.conv_general_dilated(h, w, (1, 1), 'SAME',
                                         dimension_numbers=dn)
        h = jnp.where(h > 0, h, NEG_SLOPE * h)
        mean = jnp.mean(h, axis=(0, 1, 2), keepdims=True)
        var = jnp.mean((h - mean) ** 2, axis=(0, 1, 2), keepdims=True)
        return (h - mean) * jax.lax.rsqrt(var + EPS) * g + b

    h = block(x, w1, gamma1, beta1)
    h = block(h, w2, gamma2, beta2)
    return jnp.transpose(h, (0, 3, 1, 2))


if __name__ == "__main__":
    # DoubleConv(in_channels=4, out_channels=8), mid_channels defaults to out.
    N, Cin, H, W = 2, 4, 16, 16
    Cmid = Cout = 8

    key = jax.random.PRNGKey(0)
    kx, kw1, kw2, kg1, kb1, kg2, kb2 = jax.random.split(key, 7)

    x = jax.random.normal(kx, (N, Cin, H, W), jnp.float32)
    # Conv weights in HWIO layout (deterministic, Kaiming-ish scale).
    w1 = jax.random.normal(kw1, (5, 5, Cin, Cmid), jnp.float32) * (1.0 / (5 * 5 * Cin)) ** 0.5
    w2 = jax.random.normal(kw2, (5, 5, Cmid, Cout), jnp.float32) * (1.0 / (5 * 5 * Cmid)) ** 0.5
    # BatchNorm affine params (perturbed from gamma=1, beta=0 so the affine
    # path is actually exercised).
    gamma1 = 1.0 + 0.1 * jax.random.normal(kg1, (Cmid,), jnp.float32)
    beta1 = 0.1 * jax.random.normal(kb1, (Cmid,), jnp.float32)
    gamma2 = 1.0 + 0.1 * jax.random.normal(kg2, (Cout,), jnp.float32)
    beta2 = 0.1 * jax.random.normal(kb2, (Cout,), jnp.float32)

    y_ref = _reference(x, w1, gamma1, beta1, w2, gamma2, beta2)

    # f32 MXU path: strict check against the plain-JAX reference.
    params = prepare_params(w1, gamma1, beta1, w2, gamma2, beta2, W,
                            compute_dtype=jnp.float32)
    y = jax.block_until_ready(double_conv_apply(x, params))
    assert y.shape == (N, Cout, H, W), y.shape
    assert jnp.allclose(y, y_ref, atol=1e-4, rtol=1e-4), (
        float(jnp.max(jnp.abs(y - y_ref))))

    # bf16 MXU path (native MXU dtype on v6e/v7x): BN re-normalizes most of
    # the bf16 rounding; checked with an aggregate relative-error bound.
    params_bf16 = prepare_params(w1, gamma1, beta1, w2, gamma2, beta2, W,
                                 compute_dtype=jnp.bfloat16)
    y_bf16 = jax.block_until_ready(double_conv_apply(x, params_bf16))
    rel = jnp.sqrt(jnp.mean((y_bf16 - y_ref) ** 2)) / jnp.sqrt(jnp.mean(y_ref ** 2))
    assert float(rel) < 0.05, float(rel)

    print("KERNEL_OK")
</pallas_src>

<mosaic_0001>
module attributes {stable_mosaic.version = 11 : i64} {
  func.func @double_conv_kernel(%arg0: memref<2x16x64xf32, #tpu.memory_space<vmem>>, %arg1: memref<320x128xf32, #tpu.memory_space<vmem>>, %arg2: memref<640x128xf32, #tpu.memory_space<vmem>>, %arg3: memref<1x128xf32, #tpu.memory_space<vmem>>, %arg4: memref<1x128xf32, #tpu.memory_space<vmem>>, %arg5: memref<1x128xf32, #tpu.memory_space<vmem>>, %arg6: memref<1x128xf32, #tpu.memory_space<vmem>>, %arg7: memref<8x128xf32, #tpu.memory_space<vmem>>, %arg8: memref<128x8xf32, #tpu.memory_space<vmem>>, %arg9: memref<8x128xf32, #tpu.memory_space<vmem>>, %arg10: memref<128x8xf32, #tpu.memory_space<vmem>>, %arg11: memref<32x128xf32, #tpu.memory_space<vmem>>, %arg12: memref<2x16x320xf32, #tpu.memory_space<vmem>>, %arg13: memref<2x16x640xf32, #tpu.memory_space<vmem>>) attributes {dimension_semantics = [], scalar_prefetch = 0 : i64, scratch_operands = 2 : i64, tpu.core_type = #tpu.core_type<tc>} {
    %cst = arith.constant 0.000000e+00 : f32
    %0 = vector.broadcast %cst : f32 to vector<2x2x64xf32>
    %c0 = arith.constant 0 : index
    %c0_0 = arith.constant 0 : index
    %c0_1 = arith.constant 0 : index
    %1 = vector.load %arg12[%c0, %c0_0, %c0_1] : memref<2x16x320xf32, #tpu.memory_space<vmem>>, vector<2x2x64xf32>
    tpu.vector_store %arg12[%c0, %c0_0, %c0_1], %0 {strides = array<i32>} : memref<2x16x320xf32, #tpu.memory_space<vmem>>, vector<2x2x64xf32>,
    %c0_2 = arith.constant 0 : index
    %c0_3 = arith.constant 0 : index
    %c0_4 = arith.constant 0 : index
    %2 = vector.load %arg0[%c0_2, %c0_3, %c0_4] : memref<2x16x64xf32, #tpu.memory_space<vmem>>, vector<2x14x64xf32>
    %c0_5 = arith.constant 0 : index
    %c2 = arith.constant 2 : index
    %c0_6 = arith.constant 0 : index
    %3 = vector.load %arg12[%c0_5, %c2, %c0_6] : memref<2x16x320xf32, #tpu.memory_space<vmem>>, vector<2x14x64xf32>
    tpu.vector_store %arg12[%c0_5, %c2, %c0_6], %2 {strides = array<i32>} : memref<2x16x320xf32, #tpu.memory_space<vmem>>, vector<2x14x64xf32>,
    %cst_7 = arith.constant 0.000000e+00 : f32
    %4 = vector.broadcast %cst_7 : f32 to vector<2x1x64xf32>
    %c0_8 = arith.constant 0 : index
    %c0_9 = arith.constant 0 : index
    %c64 = arith.constant 64 : index
    %5 = vector.load %arg12[%c0_8, %c0_9, %c64] : memref<2x16x320xf32, #tpu.memory_space<vmem>>, vector<2x1x64xf32>
    tpu.vector_store %arg12[%c0_8, %c0_9, %c64], %4 {strides = array<i32>} : memref<2x16x320xf32, #tpu.memory_space<vmem>>, vector<2x1x64xf32>,
    %c0_10 = arith.constant 0 : index
    %c0_11 = arith.constant 0 : index
    %c0_12 = arith.constant 0 : index
    %6 = vector.load %arg0[%c0_10, %c0_11, %c0_12] : memref<2x16x64xf32, #tpu.memory_space<vmem>>, vector<2x15x64xf32>
    %c0_13 = arith.constant 0 : index
    %c1 = arith.constant 1 : index
    %c64_14 = arith.constant 64 : index
    %7 = vector.load %arg12[%c0_13, %c1, %c64_14] : memref<2x16x320xf32, #tpu.memory_space<vmem>>, vector<2x15x64xf32>
    tpu.vector_store %arg12[%c0_13, %c1, %c64_14], %6 {strides = array<i32>} : memref<2x16x320xf32, #tpu.memory_space<vmem>>, vector<2x15x64xf32>,
    %c0_15 = arith.constant 0 : index
    %c0_16 = arith.constant 0 : index
    %c0_17 = arith.constant 0 : index
    %8 = vector.load %arg0[%c0_15, %c0_16, %c0_17] : memref<2x16x64xf32, #tpu.memory_space<vmem>>, vector<2x16x64xf32>
    %c0_18 = arith.constant 0 : index
    %c0_19 = arith.constant 0 : index
    %c128 = arith.constant 128 : index
    %9 = vector.load %arg12[%c0_18, %c0_19, %c128] : memref<2x16x320xf32, #tpu.memory_space<vmem>>, vector<2x16x64xf32>
    tpu.vector_store %arg12[%c0_18, %c0_19, %c128], %8 {strides = array<i32>} : memref<2x16x320xf32, #tpu.memory_space<vmem>>, vector<2x16x64xf32>,
    %cst_20 = arith.constant 0.000000e+00 : f32
    %10 = vector.broadcast %cst_20 : f32 to vector<2x1x64xf32>
    %c0_21 = arith.constant 0 : index
    %c15 = arith.constant 15 : index
    %c192 = arith.constant 192 : index
    %11 = vector.load %arg12[%c0_21, %c15, %c192] : memref<2x16x320xf32, #tpu.memory_space<vmem>>, vector<2x1x64xf32>
    tpu.vector_store %arg12[%c0_21, %c15, %c192], %10 {strides = array<i32>} : memref<2x16x320xf32, #tpu.memory_space<vmem>>, vector<2x1x64xf32>,
    %c0_22 = arith.constant 0 : index
    %c1_23 = arith.constant 1 : index
    %c0_24 = arith.constant 0 : index
    %12 = vector.load %arg0[%c0_22, %c1_23, %c0_24] : memref<2x16x64xf32, #tpu.memory_space<vmem>>, vector<2x15x64xf32>
    %c0_25 = arith.constant 0 : index
    %c0_26 = arith.constant 0 : index
    %c192_27 = arith.constant 192 : index
    %13 = vector.load %arg12[%c0_25, %c0_26, %c192_27] : memref<2x16x320xf32, #tpu.memory_space<vmem>>, vector<2x15x64xf32>
    tpu.vector_store %arg12[%c0_25, %c0_26, %c192_27], %12 {strides = array<i32>} : memref<2x16x320xf32, #tpu.memory_space<vmem>>, vector<2x15x64xf32>,
    %cst_28 = arith.constant 0.000000e+00 : f32
    %14 = vector.broadcast %cst_28 : f32 to vector<2x2x64xf32>
    %c0_29 = arith.constant 0 : index
    %c14 = arith.constant 14 : index
    %c256 = arith.constant 256 : index
    %15 = vector.load %arg12[%c0_29, %c14, %c256] : memref<2x16x320xf32, #tpu.memory_space<vmem>>, vector<2x2x64xf32>
    tpu.vector_store %arg12[%c0_29, %c14, %c256], %14 {strides = array<i32>} : memref<2x16x320xf32, #tpu.memory_space<vmem>>, vector<2x2x64xf32>,
    %c0_30 = arith.constant 0 : index
    %c2_31 = arith.constant 2 : index
    %c0_32 = arith.constant 0 : index
    %16 = vector.load %arg0[%c0_30, %c2_31, %c0_32] : memref<2x16x64xf32, #tpu.memory_space<vmem>>, vector<2x14x64xf32>
    %c0_33 = arith.constant 0 : index
    %c0_34 = arith.constant 0 : index
    %c256_35 = arith.constant 256 : index
    %17 = vector.load %arg12[%c0_33, %c0_34, %c256_35] : memref<2x16x320xf32, #tpu.memory_space<vmem>>, vector<2x14x64xf32>
    tpu.vector_store %arg12[%c0_33, %c0_34, %c256_35], %16 {strides = array<i32>} : memref<2x16x320xf32, #tpu.memory_space<vmem>>, vector<2x14x64xf32>,
    %c0_36 = arith.constant 0 : index
    %c0_37 = arith.constant 0 : index
    %c0_38 = arith.constant 0 : index
    %18 = vector.load %arg12[%c0_36, %c0_37, %c0_38] : memref<2x16x320xf32, #tpu.memory_space<vmem>>, vector<2x16x320xf32>
    %19 = vector.shape_cast %18 : vector<2x16x320xf32> to vector<32x320xf32>
    %c0_39 = arith.constant 0 : index
    %c0_40 = arith.constant 0 : index
    %20 = vector.load %arg1[%c0_39, %c0_40] : memref<320x128xf32, #tpu.memory_space<vmem>>, vector<320x128xf32>
    %cst_41 = arith.constant dense<0.000000e+00> : vector<32x128xf32>
    %21 = tpu.matmul %19, %20, %cst_41 {dimension_numbers = #tpu.dot_dimension_numbers<[1], [0], [0], [1], [0, 0, 1, 1], [], []>} : vector<32x320xf32>, vector<320x128xf32>, vector<32x128xf32> -> vector<32x128xf32>
    %cst_42 = arith.constant 0.00999999977 : f32
    %22 = vector.broadcast %cst_42 : f32 to vector<32x128xf32>
    %23 = arith.mulf %22, %21 : vector<32x128xf32>
    %24 = arith.maximumf %21, %23 : vector<32x128xf32>
    %cst_43 = arith.constant dense<0.000000e+00> : vector<128xf32>
    %25 = vector.multi_reduction <add>, %24, %cst_43 [0] : vector<32x128xf32> to vector<128xf32>
    %26 = vector.shape_cast %25 : vector<128xf32> to vector<1x128xf32>
    %27 = arith.mulf %24, %24 : vector<32x128xf32>
    %cst_44 = arith.constant dense<0.000000e+00> : vector<128xf32>
    %28 = vector.multi_reduction <add>, %27, %cst_44 [0] : vector<32x128xf32> to vector<128xf32>
    %29 = vector.shape_cast %28 : vector<128xf32> to vector<1x128xf32>
    %30 = tpu.iota {dimensions = array<i32: 0>} : vector<2x128xi32>
    %c0_i32 = arith.constant 0 : i32
    %31 = vector.broadcast %c0_i32 : i32 to vector<2x128xi32>
    %32 = arith.cmpi eq, %30, %31 : vector<2x128xi32>
    %33 = vector.shape_cast %26 : vector<1x128xf32> to vector<1x128xf32>
    %34 = vector.broadcast %33 : vector<1x128xf32> to vector<2x128xf32>
    %35 = vector.shape_cast %29 : vector<1x128xf32> to vector<1x128xf32>
    %36 = vector.broadcast %35 : vector<1x128xf32> to vector<2x128xf32>
    %37 = arith.select %32, %34, %36 : vector<2x128xi1>, vector<2x128xf32>
    %c0_45 = arith.constant 0 : index
    %c0_46 = arith.constant 0 : index
    %38 = vector.load %arg8[%c0_45, %c0_46] : memref<128x8xf32, #tpu.memory_space<vmem>>, vector<128x8xf32>
    %cst_47 = arith.constant dense<0.000000e+00> : vector<2x8xf32>
    %39 = tpu.matmul %37, %38, %cst_47 {dimension_numbers = #tpu.dot_dimension_numbers<[1], [0], [0], [1], [0, 0, 1, 1], [], []>} : vector<2x128xf32>, vector<128x8xf32>, vector<2x8xf32> -> vector<2x8xf32>
    %cst_48 = arith.constant 0.001953125 : f32
    %40 = vector.broadcast %cst_48 : f32 to vector<2x8xf32>
    %41 = arith.mulf %39, %40 : vector<2x8xf32>
    %c0_49 = arith.constant 0 : index
    %c0_50 = arith.constant 0 : index
    %42 = vector.load %arg7[%c0_49, %c0_50] : memref<8x128xf32, #tpu.memory_space<vmem>>, vector<8x128xf32>
    %cst_51 = arith.constant dense<0.000000e+00> : vector<2x128xf32>
    %43 = tpu.matmul %41, %42, %cst_51 {dimension_numbers = #tpu.dot_dimension_numbers<[1], [0], [0], [1], [0, 0, 1, 1], [], []>} : vector<2x8xf32>, vector<8x128xf32>, vector<2x128xf32> -> vector<2x128xf32>
    %44 = vector.extract_strided_slice %43 {offsets = [0, 0], sizes = [1, 128], strides = [1, 1]} : vector<2x128xf32> to vector<1x128xf32>
    %45 = vector.extract_strided_slice %43 {offsets = [1, 0], sizes = [1, 128], strides = [1, 1]} : vector<2x128xf32> to vector<1x128xf32>
    %46 = arith.mulf %44, %44 : vector<1x128xf32>
    %47 = arith.subf %45, %46 : vector<1x128xf32>
    %cst_52 = arith.constant 0.000000e+00 : f32
    %48 = vector.broadcast %cst_52 : f32 to vector<1x128xf32>
    %49 = arith.maximumf %47, %48 : vector<1x128xf32>
    %c0_53 = arith.constant 0 : index
    %c0_54 = arith.constant 0 : index
    %50 = vector.load %arg3[%c0_53, %c0_54] : memref<1x128xf32, #tpu.memory_space<vmem>>, vector<1x128xf32>
    %cst_55 = arith.constant 9.99999974E-6 : f32
    %51 = vector.broadcast %cst_55 : f32 to vector<1x128xf32>
    %52 = arith.addf %49, %51 : vector<1x128xf32>
    %53 = math.rsqrt %52 : vector<1x128xf32>
    %54 = arith.mulf %50, %53 : vector<1x128xf32>
    %c0_56 = arith.constant 0 : index
    %c0_57 = arith.constant 0 : index
    %55 = vector.load %arg4[%c0_56, %c0_57] : memref<1x128xf32, #tpu.memory_space<vmem>>, vector<1x128xf32>
    %56 = arith.mulf %44, %54 : vector<1x128xf32>
    %57 = arith.subf %55, %56 : vector<1x128xf32>
    %58 = vector.broadcast %54 : vector<1x128xf32> to vector<32x128xf32>
    %59 = arith.mulf %24, %58 : vector<32x128xf32>
    %60 = vector.broadcast %57 : vector<1x128xf32> to vector<32x128xf32>
    %61 = arith.addf %59, %60 : vector<32x128xf32>
    %62 = vector.shape_cast %61 : vector<32x128xf32> to vector<2x16x128xf32>
    %cst_58 = arith.constant 0.000000e+00 : f32
    %63 = vector.broadcast %cst_58 : f32 to vector<2x2x128xf32>
    %c0_59 = arith.constant 0 : index
    %c0_60 = arith.constant 0 : index
    %c0_61 = arith.constant 0 : index
    %64 = vector.load %arg13[%c0_59, %c0_60, %c0_61] : memref<2x16x640xf32, #tpu.memory_space<vmem>>, vector<2x2x128xf32>
    tpu.vector_store %arg13[%c0_59, %c0_60, %c0_61], %63 {strides = array<i32>} : memref<2x16x640xf32, #tpu.memory_space<vmem>>, vector<2x2x128xf32>,
    %65 = vector.extract_strided_slice %62 {offsets = [0, 0, 0], sizes = [2, 14, 128], strides = [1, 1, 1]} : vector<2x16x128xf32> to vector<2x14x128xf32>
    %c0_62 = arith.constant 0 : index
    %c2_63 = arith.constant 2 : index
    %c0_64 = arith.constant 0 : index
    %66 = vector.load %arg13[%c0_62, %c2_63, %c0_64] : memref<2x16x640xf32, #tpu.memory_space<vmem>>, vector<2x14x128xf32>
    tpu.vector_store %arg13[%c0_62, %c2_63, %c0_64], %65 {strides = array<i32>} : memref<2x16x640xf32, #tpu.memory_space<vmem>>, vector<2x14x128xf32>,
    %cst_65 = arith.constant 0.000000e+00 : f32
    %67 = vector.broadcast %cst_65 : f32 to vector<2x1x128xf32>
    %c0_66 = arith.constant 0 : index
    %c0_67 = arith.constant 0 : index
    %c128_68 = arith.constant 128 : index
    %68 = vector.load %arg13[%c0_66, %c0_67, %c128_68] : memref<2x16x640xf32, #tpu.memory_space<vmem>>, vector<2x1x128xf32>
    tpu.vector_store %arg13[%c0_66, %c0_67, %c128_68], %67 {strides = array<i32>} : memref<2x16x640xf32, #tpu.memory_space<vmem>>, vector<2x1x128xf32>,
    %69 = vector.extract_strided_slice %62 {offsets = [0, 0, 0], sizes = [2, 15, 128], strides = [1, 1, 1]} : vector<2x16x128xf32> to vector<2x15x128xf32>
    %c0_69 = arith.constant 0 : index
    %c1_70 = arith.constant 1 : index
    %c128_71 = arith.constant 128 : index
    %70 = vector.load %arg13[%c0_69, %c1_70, %c128_71] : memref<2x16x640xf32, #tpu.memory_space<vmem>>, vector<2x15x128xf32>
    tpu.vector_store %arg13[%c0_69, %c1_70, %c128_71], %69 {strides = array<i32>} : memref<2x16x640xf32, #tpu.memory_space<vmem>>, vector<2x15x128xf32>,
    %c0_72 = arith.constant 0 : index
    %c0_73 = arith.constant 0 : index
    %c256_74 = arith.constant 256 : index
    %71 = vector.load %arg13[%c0_72, %c0_73, %c256_74] : memref<2x16x640xf32, #tpu.memory_space<vmem>>, vector<2x16x128xf32>
    tpu.vector_store %arg13[%c0_72, %c0_73, %c256_74], %62 {strides = array<i32>} : memref<2x16x640xf32, #tpu.memory_space<vmem>>, vector<2x16x128xf32>,
    %cst_75 = arith.constant 0.000000e+00 : f32
    %72 = vector.broadcast %cst_75 : f32 to vector<2x1x128xf32>
    %c0_76 = arith.constant 0 : index
    %c15_77 = arith.constant 15 : index
    %c384 = arith.constant 384 : index
    %73 = vector.load %arg13[%c0_76, %c15_77, %c384] : memref<2x16x640xf32, #tpu.memory_space<vmem>>, vector<2x1x128xf32>
    tpu.vector_store %arg13[%c0_76, %c15_77, %c384], %72 {strides = array<i32>} : memref<2x16x640xf32, #tpu.memory_space<vmem>>, vector<2x1x128xf32>,
    %74 = vector.extract_strided_slice %62 {offsets = [0, 1, 0], sizes = [2, 15, 128], strides = [1, 1, 1]} : vector<2x16x128xf32> to vector<2x15x128xf32>
    %c0_78 = arith.constant 0 : index
    %c0_79 = arith.constant 0 : index
    %c384_80 = arith.constant 384 : index
    %75 = vector.load %arg13[%c0_78, %c0_79, %c384_80] : memref<2x16x640xf32, #tpu.memory_space<vmem>>, vector<2x15x128xf32>
    tpu.vector_store %arg13[%c0_78, %c0_79, %c384_80], %74 {strides = array<i32>} : memref<2x16x640xf32, #tpu.memory_space<vmem>>, vector<2x15x128xf32>,
    %cst_81 = arith.constant 0.000000e+00 : f32
    %76 = vector.broadcast %cst_81 : f32 to vector<2x2x128xf32>
    %c0_82 = arith.constant 0 : index
    %c14_83 = arith.constant 14 : index
    %c512 = arith.constant 512 : index
    %77 = vector.load %arg13[%c0_82, %c14_83, %c512] : memref<2x16x640xf32, #tpu.memory_space<vmem>>, vector<2x2x128xf32>
    tpu.vector_store %arg13[%c0_82, %c14_83, %c512], %76 {strides = array<i32>} : memref<2x16x640xf32, #tpu.memory_space<vmem>>, vector<2x2x128xf32>,
    %78 = vector.extract_strided_slice %62 {offsets = [0, 2, 0], sizes = [2, 14, 128], strides = [1, 1, 1]} : vector<2x16x128xf32> to vector<2x14x128xf32>
    %c0_84 = arith.constant 0 : index
    %c0_85 = arith.constant 0 : index
    %c512_86 = arith.constant 512 : index
    %79 = vector.load %arg13[%c0_84, %c0_85, %c512_86] : memref<2x16x640xf32, #tpu.memory_space<vmem>>, vector<2x14x128xf32>
    tpu.vector_store %arg13[%c0_84, %c0_85, %c512_86], %78 {strides = array<i32>} : memref<2x16x640xf32, #tpu.memory_space<vmem>>, vector<2x14x128xf32>,
    %c0_87 = arith.constant 0 : index
    %c0_88 = arith.constant 0 : index
    %c0_89 = arith.constant 0 : index
    %80 = vector.load %arg13[%c0_87, %c0_88, %c0_89] : memref<2x16x640xf32, #tpu.memory_space<vmem>>, vector<2x16x640xf32>
    %81 = vector.shape_cast %80 : vector<2x16x640xf32> to vector<32x640xf32>
    %c0_90 = arith.constant 0 : index
    %c0_91 = arith.constant 0 : index
    %82 = vector.load %arg2[%c0_90, %c0_91] : memref<640x128xf32, #tpu.memory_space<vmem>>, vector<640x128xf32>
    %cst_92 = arith.constant dense<0.000000e+00> : vector<32x128xf32>
    %83 = tpu.matmul %81, %82, %cst_92 {dimension_numbers = #tpu.dot_dimension_numbers<[1], [0], [0], [1], [0, 0, 1, 1], [], []>} : vector<32x640xf32>, vector<640x128xf32>, vector<32x128xf32> -> vector<32x128xf32>
    %cst_93 = arith.constant 0.00999999977 : f32
    %84 = vector.broadcast %cst_93 : f32 to vector<32x128xf32>
    %85 = arith.mulf %84, %83 : vector<32x128xf32>
    %86 = arith.maximumf %83, %85 : vector<32x128xf32>
    %cst_94 = arith.constant dense<0.000000e+00> : vector<128xf32>
    %87 = vector.multi_reduction <add>, %86, %cst_94 [0] : vector<32x128xf32> to vector<128xf32>
    %88 = vector.shape_cast %87 : vector<128xf32> to vector<1x128xf32>
    %89 = arith.mulf %86, %86 : vector<32x128xf32>
    %cst_95 = arith.constant dense<0.000000e+00> : vector<128xf32>
    %90 = vector.multi_reduction <add>, %89, %cst_95 [0] : vector<32x128xf32> to vector<128xf32>
    %91 = vector.shape_cast %90 : vector<128xf32> to vector<1x128xf32>
    %92 = tpu.iota {dimensions = array<i32: 0>} : vector<2x128xi32>
    %c0_i32_96 = arith.constant 0 : i32
    %93 = vector.broadcast %c0_i32_96 : i32 to vector<2x128xi32>
    %94 = arith.cmpi eq, %92, %93 : vector<2x128xi32>
    %95 = vector.shape_cast %88 : vector<1x128xf32> to vector<1x128xf32>
    %96 = vector.broadcast %95 : vector<1x128xf32> to vector<2x128xf32>
    %97 = vector.shape_cast %91 : vector<1x128xf32> to vector<1x128xf32>
    %98 = vector.broadcast %97 : vector<1x128xf32> to vector<2x128xf32>
    %99 = arith.select %94, %96, %98 : vector<2x128xi1>, vector<2x128xf32>
    %c0_97 = arith.constant 0 : index
    %c0_98 = arith.constant 0 : index
    %100 = vector.load %arg10[%c0_97, %c0_98] : memref<128x8xf32, #tpu.memory_space<vmem>>, vector<128x8xf32>
    %cst_99 = arith.constant dense<0.000000e+00> : vector<2x8xf32>
    %101 = tpu.matmul %99, %100, %cst_99 {dimension_numbers = #tpu.dot_dimension_numbers<[1], [0], [0], [1], [0, 0, 1, 1], [], []>} : vector<2x128xf32>, vector<128x8xf32>, vector<2x8xf32> -> vector<2x8xf32>
    %cst_100 = arith.constant 0.001953125 : f32
    %102 = vector.broadcast %cst_100 : f32 to vector<2x8xf32>
    %103 = arith.mulf %101, %102 : vector<2x8xf32>
    %c0_101 = arith.constant 0 : index
    %c0_102 = arith.constant 0 : index
    %104 = vector.load %arg9[%c0_101, %c0_102] : memref<8x128xf32, #tpu.memory_space<vmem>>, vector<8x128xf32>
    %cst_103 = arith.constant dense<0.000000e+00> : vector<2x128xf32>
    %105 = tpu.matmul %103, %104, %cst_103 {dimension_numbers = #tpu.dot_dimension_numbers<[1], [0], [0], [1], [0, 0, 1, 1], [], []>} : vector<2x8xf32>, vector<8x128xf32>, vector<2x128xf32> -> vector<2x128xf32>
    %106 = vector.extract_strided_slice %105 {offsets = [0, 0], sizes = [1, 128], strides = [1, 1]} : vector<2x128xf32> to vector<1x128xf32>
    %107 = vector.extract_strided_slice %105 {offsets = [1, 0], sizes = [1, 128], strides = [1, 1]} : vector<2x128xf32> to vector<1x128xf32>
    %108 = arith.mulf %106, %106 : vector<1x128xf32>
    %109 = arith.subf %107, %108 : vector<1x128xf32>
    %cst_104 = arith.constant 0.000000e+00 : f32
    %110 = vector.broadcast %cst_104 : f32 to vector<1x128xf32>
    %111 = arith.maximumf %109, %110 : vector<1x128xf32>
    %c0_105 = arith.constant 0 : index
    %c0_106 = arith.constant 0 : index
    %112 = vector.load %arg5[%c0_105, %c0_106] : memref<1x128xf32, #tpu.memory_space<vmem>>, vector<1x128xf32>
    %cst_107 = arith.constant 9.99999974E-6 : f32
    %113 = vector.broadcast %cst_107 : f32 to vector<1x128xf32>
    %114 = arith.addf %111, %113 : vector<1x128xf32>
    %115 = math.rsqrt %114 : vector<1x128xf32>
    %116 = arith.mulf %112, %115 : vector<1x128xf32>
    %c0_108 = arith.constant 0 : index
    %c0_109 = arith.constant 0 : index
    %117 = vector.load %arg6[%c0_108, %c0_109] : memref<1x128xf32, #tpu.memory_space<vmem>>, vector<1x128xf32>
    %118 = arith.mulf %106, %116 : vector<1x128xf32>
    %119 = arith.subf %117, %118 : vector<1x128xf32>
    %120 = vector.broadcast %116 : vector<1x128xf32> to vector<32x128xf32>
    %121 = arith.mulf %86, %120 : vector<32x128xf32>
    %122 = vector.broadcast %119 : vector<1x128xf32> to vector<32x128xf32>
    %123 = arith.addf %121, %122 : vector<32x128xf32>
    %c0_110 = arith.constant 0 : index
    %c0_111 = arith.constant 0 : index
    %124 = vector.load %arg11[%c0_110, %c0_111] : memref<32x128xf32, #tpu.memory_space<vmem>>, vector<32x128xf32>
    tpu.vector_store %arg11[%c0_110, %c0_111], %123 {strides = array<i32>} : memref<32x128xf32, #tpu.memory_space<vmem>>, vector<32x128xf32>,
    return
  }
}

</mosaic_0001>

<bundles_post_ra>
// kernel: double_conv_apply.1
= control target key start
LH: loop header
LB: loop body
LE: loop exit
PB: predicated region body
PF: predicated region fallthrough
CT: control target
= control target key end

     0   :  { %16 = vsyncpa [#allocation5], 0  ;;  %s1899_s17 = smov [#allocation4]   ;;  %s2560_s0 = inlined_call_operand.vmem [shape: f32[2,16,64], index: 0, kind: input, shape index: {}]   ;;  %s2561_s1 = inlined_call_operand.hbm [shape: f32[320,128], index: 1, kind: input, shape index: {}]   ;;  %s2562_s2 = inlined_call_operand.vmem [shape: f32[640,128], index: 2, kind: input, shape index: {}]   ;;  %s2563_s3 = inlined_call_operand.vmem [shape: f32[1,128], index: 3, kind: input, shape index: {}]   ;;  %s2564_s4 = inlined_call_operand.vmem [shape: f32[1,128], index: 4, kind: input, shape index: {}]   ;;  %s2565_s5 = inlined_call_operand.vmem [shape: f32[1,128], index: 5, kind: input, shape index: {}]   ;;  %s2566_s6 = inlined_call_operand.vmem [shape: f32[1,128], index: 6, kind: input, shape index: {}]   ;;  %s2567_s7 = inlined_call_operand.vmem [shape: f32[8,128], index: 7, kind: input, shape index: {}]   ;;  %s2568_s8 = inlined_call_operand.vmem [shape: f32[128,8], index: 8, kind: input, shape index: {}]   ;;  %s2569_s9 = inlined_call_operand.vmem [shape: f32[8,128], index: 9, kind: input, shape index: {}]   ;;  %s2570_s10 = inlined_call_operand.vmem [shape: f32[128,8], index: 10, kind: input, shape index: {}]   ;;  %s2571_s11 = inlined_call_operand.vmem [shape: f32[32,128], index: 11, kind: output, shape index: {}]  }
   0x1   :  { %s24_s18 = sshll.u32 %s1899_s17, 4  ;;  %s1875_s21 = scalar_lea.hbm %s2561_s1, 5120  ;;  %s25_s18 = int_to_ptr.vmem [resolvable:$true] %s24_s18 }
   0x2   :  { %p1876_p0 = scmp.ne.s32.totalorder %s2561_s1, %s1875_s21  ;;  %p1879_p1 = scmp.lt.u32.totalorder %s1875_s21, %s2561_s1 }
   0x4   :  { %p1881_p2 = pnand %p1879_p1, %p1876_p0 }
   0x6   :  { %1884 = shalt.err (!%p1881_p2)
}
   0x7   :  { %s1885_s26 = scalar_lea.vmem %s25_s18, 5120  ;;  %p1890_p4 = scmp.lt.s32.totalorder %s25_s18, %s25_s18 }
   0x8   :  { %p1886_p3 = scmp.ne.s32.totalorder %s25_s18, %s1885_s26  ;;  %p1891_p5 = scmp.lt.s32.totalorder %s1885_s26, %s1885_s26 }
   0xa   :  { %p1892_p6 = por %p1891_p5, %p1890_p4 }
   0xc   :  { %p1893_p7 = pnand %p1892_p6, %p1886_p3 }
   0xe   :  { %1896 = shalt.err (!%p1893_p7)
}
   0xf   :  { %s1900_s27 = smov 128   ;;  %s1901_s28 = smov 8  }
  0x10   :  { %30 = dma.hbm_to_vmem [thread:$0]  %s2561_s1, 5120, %s25_s18, [#allocation5], %s1900_s27, %s1900_s27, %s1901_s28  }
  0x11   :  { %1897 = dma.done.wait [#allocation5], 5120  }
  0x12   :  { %1898 = vsyncadd [#allocation5], 4294962176  ;;  %vm80_vm0 = vcmask 1040896   ;;  %vm52_vm1 = vcmask 517120   ;;  %v1902_v0 = vmov 0.0   ;;  %vm151_vm2 = vcmask 523270  }
  0x13   :  { %643 = vst [vmem:[#allocation3] sm:$0x3] %v1902_v0  ;;  %644 = vst [vmem:[#allocation3 + $0x50] sm:$0x3] %v1902_v0  ;;  %vm76_vm3 = vcmask 523264   ;;  %v126_v1 = vld [vmem:[%s2560_s0 + $0x1] sm:$0xff] }
  0x14   :  { %663 = vst [vmem:[#allocation3 + $0x8] sm:$0x1] %v1902_v0  ;;  %664 = vst [vmem:[#allocation3 + $0x58] sm:$0x1] %v1902_v0  ;;  %v127_v2 = vld [vmem:[%s2560_s0 + $0x9] sm:$0x7f] }
  0x15   :  { %683 = vst [vmem:[#allocation3 + $0x47] sm:$0x1] %v1902_v0  ;;  %684 = vst [vmem:[#allocation3 + $0x97] sm:$0x1] %v1902_v0  ;;  %v2004_v3 = vld [vmem:[%s2560_s0] sm:$0xff]  ;;  %vm74_vm4 = vcmask 523266  }
  0x16   :  { %700 = vst [vmem:[#allocation3 + $0x48] sm:$0xc0] %v1902_v0  ;;  %701 = vst [vmem:[#allocation3 + $0x98] sm:$0xc0] %v1902_v0  ;;  %s1903_s17 = smov 64   ;;  %v92_v4 = vrot.slane %v2004_v3, 7 }
  0x17   :  { %53 = vst.msk [vmem:[#allocation2] sm:$0x3] %vm52_vm1, %v1902_v0  ;;  %54 = vst.msk [vmem:[#allocation2 + $0x30] sm:$0x3] %vm52_vm1, %v1902_v0  ;;  %134 = vrot.lane.b32.xlu0 %v126_v1, %s1903_s17  ;;  %136 = vrot.lane.b32.xlu1 %v127_v2, %s1903_s17  ;;  %v84_v5 = vld [vmem:[%s2560_s0 + $0x8] sm:$0x7f] }
  0x18   :  { %81 = vst.msk [vmem:[#allocation2] sm:$0x1] %vm80_vm0, %v1902_v0  ;;  %82 = vst.msk [vmem:[#allocation2 + $0x30] sm:$0x1] %vm80_vm0, %v1902_v0  ;;  %vm91_vm5 = vcmask 1040384   ;;  %v191_v6 = vld [vmem:[#allocation4 + $0x80] sm:$0xff] }
  0x19   :  { %152 = vst.msk [vmem:[#allocation2 + $0x28] sm:$0xc0] %vm151_vm2, %v1902_v0  ;;  %153 = vst.msk [vmem:[#allocation2 + $0x58] sm:$0xc0] %vm151_vm2, %v1902_v0  ;;  %v64_v7 = vrot.slane %v2004_v3, 6  ;;  %v93_v8 = vrot.slane %v84_v5, 7 }
  0x1a   :  { %120 = vst.msk [vmem:[#allocation2 + $0x8] sm:$0xff] %vm76_vm3, %v2004_v3  ;;  %v2018_v9 = vld [vmem:[%s2560_s0 + $0x10] sm:$0xff]  ;;  %v86_v10 = vld [vmem:[%s2560_s0 + $0x18] sm:$0x7f]  ;;  %v192_v11 = vld [vmem:[#allocation4 + $0x88] sm:$0xff]  ;;  %vm63_vm6 = vcmask 1041408  }
  0x1b   :  { %v175_v12 = vld [vmem:[#allocation4] sm:$0xff]  ;;  %v176_v13 = vld [vmem:[#allocation4 + $0x8] sm:$0xff]  ;;  %75 = vst.msk [vmem:[#allocation2] sm:$0xfc] %vm74_vm4, %v64_v7  ;;  %v67_v14 = vrot.slane %v2018_v9, 6  ;;  %v94_v15 = vsel %vm91_vm5, %v92_v4, %v93_v8  ;;  %v1671_v16 = vpack.c.bf16 %v192_v11, %v191_v6  ;;  %v193_v18 = vld [vmem:[#allocation4 + $0x90] sm:$0xff]  ;;  %98 = vrot.lane.b32.xlu0 %v92_v4, %s1903_s17 }
  0x1c   :  { %122 = vst.msk [vmem:[#allocation2 + $0x38] sm:$0xff] %vm76_vm3, %v2018_v9  ;;  %v1673_v17 = vpack.c.bf16 %v176_v13, %v175_v12  ;;  %v194_v19 = vld [vmem:[#allocation4 + $0x98] sm:$0xff]  ;;  %v177_v20 = vld [vmem:[#allocation4 + $0x10] sm:$0xff]  ;;  %100 = vrot.lane.b32.xlu1 %v94_v15, %s1903_s17  ;;  %v95_v21 = vrot.slane %v2018_v9, 7  ;;  %v195_v24 = vld [vmem:[#allocation4 + $0xa0] sm:$0xff]  ;;  %v96_v27 = vrot.slane %v86_v10, 7 }
  0x1d   :  { %v1675_v22 = vpack.c.bf16 %v194_v19, %v193_v18  ;;  %v178_v23 = vld [vmem:[#allocation4 + $0x18] sm:$0xff]  ;;  %v196_v25 = vld [vmem:[#allocation4 + $0xa8] sm:$0xff]  ;;  %78 = vst.msk [vmem:[#allocation2 + $0x30] sm:$0xfc] %vm74_vm4, %v67_v14  ;;  %1672 = vmatprep.subr.bf16.mxu0 %v1671_v16  ;;  %v179_v30 = vld [vmem:[#allocation4 + $0x20] sm:$0xff]  ;;  %vm159_vm7 = vcmask 521216  }
  0x1e   :  { %v128_v26 = vld [vmem:[%s2560_s0 + $0x11] sm:$0xff]  ;;  %1674 = vmatpush3.bf16.msra.mxu0 %v1673_v17  ;;  %v1677_v28 = vpack.c.bf16 %v178_v23, %v177_v20  ;;  %v1679_v29 = vpack.c.bf16 %v196_v25, %v195_v24  ;;  %v180_v31 = vld [vmem:[#allocation4 + $0x28] sm:$0xff]  ;;  %v207_v34 = vld [vmem:[#allocation4 + $0x100] sm:$0xff]  ;;  %v97_v37 = vsel %vm91_vm5, %v95_v21, %v96_v27  ;;  %vm112_vm8 = vcmask 1048064  }
  0x1f   :  { %1676 = vmatprep.subr.bf16.mxu0 %v1675_v22  ;;  %v197_v32 = vld [vmem:[#allocation4 + $0xb0] sm:$0xff]  ;;  %138 = vrot.lane.b32.xlu0 %v128_v26, %s1903_s17  ;;  %v198_v33 = vld [vmem:[#allocation4 + $0xb8] sm:$0xff]  ;;  %v208_v35 = vld [vmem:[#allocation4 + $0x108] sm:$0xff]  ;;  %v1681_v39 = vpack.c.bf16 %v180_v31, %v179_v30  ;;  %vm147_vm9 = vcmask 1047040   ;;  %vm110_vm10 = vcmask 1048065   ;;  %vm1905_vm11 = vmmov 0  }
  0x20   :  { %102 = vrot.lane.b32.xlu1 %v95_v21, %s1903_s17  ;;  %v129_v36 = vld [vmem:[%s2560_s0 + $0x19] sm:$0x7f]  ;;  %v1703_v38 = vpack.c.bf16 %v208_v35, %v207_v34  ;;  %v209_v40 = vld [vmem:[#allocation4 + $0x110] sm:$0xff]  ;;  %v1683_v42 = vpack.c.bf16 %v198_v33, %v197_v32  ;;  %v117_v46 = vld [vmem:[%s2560_s0 + $0x8] sm:$0xff]  ;;  %vm519_vm13 = vcmask 64512   ;;  %vm685_vm14 = vcmask 1046528  }
  0x21   :  { %v210_v41 = vld [vmem:[#allocation4 + $0x118] sm:$0xff]  ;;  %v181_v43 = vld [vmem:[#allocation4 + $0x30] sm:$0xff]  ;;  %v199_v47 = vld [vmem:[#allocation4 + $0xc0] sm:$0xff]  ;;  %121 = vst.msk [vmem:[#allocation2 + $0x20] sm:$0xff] %vm76_vm3, %v117_v46  ;;  %vm702_vm15 = vcmask 1045504  }
  0x22   :  { %1678 = vmatpush3.bf16.msra.mxu0 %v1677_v28  ;;  %v182_v44 = vld [vmem:[#allocation4 + $0x38] sm:$0xff]  ;;  %1704 = vmatprep.subr.bf16.mxu1 %v1703_v38  ;;  %v1707_v45 = vpack.c.bf16 %v210_v41, %v209_v40  ;;  %v200_v48 = vld [vmem:[#allocation4 + $0xc8] sm:$0xff]  ;;  %v211_v49 = vld [vmem:[#allocation4 + $0x120] sm:$0xff]  ;;  %124 = vst.msk [vmem:[#allocation2 + $0x27] sm:$0x1] %vm80_vm0, %v1902_v0 }
  0x23   :  { %1680 = vmatprep.subr.bf16.mxu0 %v1679_v29  ;;  %140 = vrot.lane.b32.xlu0 %v129_v36, %s1903_s17  ;;  %v183_v50 = vld [vmem:[#allocation4 + $0x40] sm:$0xff]  ;;  %v212_v51 = vld [vmem:[#allocation4 + $0x128] sm:$0xff]  ;;  %v1685_v53 = vpack.c.bf16 %v182_v44, %v181_v43  ;;  %v201_v55 = vld [vmem:[#allocation4 + $0xd0] sm:$0xff]  ;;  %v1687_v59 = vpack.c.bf16 %v200_v48, %v199_v47 }
  0x24   :  { %104 = vrot.lane.b32.xlu1 %v97_v37, %s1903_s17  ;;  %1706 = vmatpush3.bf16.msra.mxu1 %v1703_v38  ;;  %v56_v52 = vld [vmem:[%s2560_s0 + $0x8] sm:$0x3f]  ;;  %v202_v56 = vld [vmem:[#allocation4 + $0xd8] sm:$0xff]  ;;  %v1711_v57 = vpack.c.bf16 %v212_v51, %v211_v49  ;;  %v213_v60 = vld [vmem:[#allocation4 + $0x130] sm:$0xff]  ;;  %v1904_v49 = vmov 0.0|0.0  }
  0x25   :  { %v184_v54 = vld [vmem:[#allocation4 + $0x48] sm:$0xff]  ;;  %1708 = vmatprep.subr.bf16.mxu1 %v1707_v45  ;;  %v65_v58 = vrot.slane %v56_v52, 6  ;;  %v214_v61 = vld [vmem:[#allocation4 + $0x138] sm:$0xff]  ;;  %v1691_v10 = vpack.c.bf16 %v202_v56, %v201_v55  ;;  %v185_v11 = vld [vmem:[#allocation4 + $0x50] sm:$0xff] }
  0x26   :  { %1682 = vmatpush3.bf16.msra.mxu0 %v1681_v39  ;;  %v154_v62 = vld [vmem:[%s2560_s0 + $0x2] sm:$0xff]  ;;  %v155_v1 = vld [vmem:[%s2560_s0 + $0xa] sm:$0x3f]  ;;  %v119_v2 = vld [vmem:[%s2560_s0 + $0x18] sm:$0xff]  ;;  %v1715_v8 = vpack.c.bf16 %v214_v61, %v213_v60 }
  0x27   :  { %1684 = vmatprep.subr.bf16.mxu0 %v1683_v42  ;;  %v66_v63 = vsel %vm63_vm6, %v64_v7, %v65_v58  ;;  %158 = vst.msk [vmem:[#allocation2 + $0x10] sm:$0xff] %vm76_vm3, %v154_v62  ;;  %v58_v4 = vld [vmem:[%s2560_s0 + $0x18] sm:$0x3f]  ;;  %123 = vst.msk [vmem:[#allocation2 + $0x50] sm:$0xff] %vm76_vm3, %v119_v2  ;;  %v1689_v7 = vpack.c.bf16 %v184_v54, %v183_v50  ;;  %v203_v15 = vld [vmem:[#allocation4 + $0xe0] sm:$0xff] }
  0x28   :  { %1710 = vmatpush3.bf16.msra.mxu1 %v1707_v45  ;;  %77 = vst.msk [vmem:[#allocation2 + $0x18] sm:$0xff] %vm76_vm3, %v66_v63  ;;  %v68_v3 = vrot.slane %v58_v4, 6  ;;  %v156_v5 = vld [vmem:[%s2560_s0 + $0x12] sm:$0xff]  ;;  %v157_v6 = vld [vmem:[%s2560_s0 + $0x1a] sm:$0x3f]  ;;  %v204_v16 = vld [vmem:[#allocation4 + $0xe8] sm:$0xff] }
  0x29   :  { %160 = vst.msk [vmem:[#allocation2 + $0x28] sm:$0x3f] %vm159_vm7, %v155_v1  ;;  %1712 = vmatprep.subr.bf16.mxu1 %v1711_v57  ;;  %162 = vst.msk [vmem:[#allocation2 + $0x58] sm:$0x3f] %vm159_vm7, %v157_v6  ;;  %v186_v12 = vld [vmem:[#allocation4 + $0x58] sm:$0xff]  ;;  %v1695_v18 = vpack.c.bf16 %v204_v16, %v203_v15  ;;  %v187_v19 = vld [vmem:[#allocation4 + $0x60] sm:$0xff] }
  0x2a   :  { %1686 = vmatpush3.bf16.msra.mxu0 %v1685_v53  ;;  %125 = vst.msk [vmem:[#allocation2 + $0x57] sm:$0x1] %vm80_vm0, %v1902_v0  ;;  %v69_v13 = vsel %vm63_vm6, %v67_v14, %v68_v3  ;;  %v1693_v17 = vpack.c.bf16 %v186_v12, %v185_v11  ;;  %v188_v20 = vld [vmem:[#allocation4 + $0x68] sm:$0xff]  ;;  %v205_v22 = vld [vmem:[#allocation4 + $0xf0] sm:$0xff]  ;;  %v206_v23 = vld [vmem:[#allocation4 + $0xf8] sm:$0xff] }
  0x2b   :  { %161 = vst.msk [vmem:[#allocation2 + $0x40] sm:$0xff] %vm76_vm3, %v156_v5  ;;  %1688 = vmatprep.subr.bf16.mxu0 %v1687_v59  ;;  %79 = vst.msk [vmem:[#allocation2 + $0x48] sm:$0xff] %vm76_vm3, %v69_v13  ;;  %v1697_v14 = vpack.c.bf16 %v188_v20, %v187_v19  ;;  %v1699_v25 = vpack.c.bf16 %v206_v23, %v205_v22  ;;  %v189_v26 = vld [vmem:[#allocation4 + $0x70] sm:$0xff]  ;;  %v190_v27 = vld [vmem:[#allocation4 + $0x78] sm:$0xff] }
  0x2c   :  { %1714 = vmatpush3.bf16.msra.mxu1 %v1711_v57  ;;  %v1701_v29 = vpack.c.bf16 %v190_v27, %v189_v26  ;;  %v431_v46 = vld [vmem:[%s2568_s8] sm:$0xff]  ;;  %v432_v47 = vld [vmem:[%s2568_s8 + $0x8] sm:$0xff]  ;;  %v433_v50 = vld [vmem:[%s2568_s8 + $0x10] sm:$0xff] }
  0x2d   :  { %1716 = vmatprep.subr.bf16.mxu1 %v1715_v8  ;;  %v1720_v48 = vpack.c.bf16 %v432_v47, %v431_v46  ;;  %v434_v51 = vld [vmem:[%s2568_s8 + $0x18] sm:$0xff]  ;;  %v435_v53 = vld [vmem:[%s2568_s8 + $0x20] sm:$0xff]  ;;  %v436_v54 = vld [vmem:[%s2568_s8 + $0x28] sm:$0xff] }
  0x2e   :  { %1690 = vmatpush3.bf16.msra.mxu0 %v1689_v7  ;;  %v165_v21 = vld [vmem:[#allocation2 + $0x10] sm:$0xff]  ;;  %v1723_v52 = vpack.c.bf16 %v434_v51, %v433_v50  ;;  %v1726_v55 = vpack.c.bf16 %v436_v54, %v435_v53  ;;  %v438_v57 = vld [vmem:[%s2568_s8 + $0x38] sm:$0xff]  ;;  %v439_v59 = vld [vmem:[%s2568_s8 + $0x40] sm:$0xff]  ;;  %v427_v51 = vlaneseq }
  0x2f   :  { %1692 = vmatprep.subr.bf16.mxu0 %v1691_v10  ;;  %1547 = vmatprep.mubr.msk.f32.mxu1 %vm76_vm3, %v165_v21  ;;  %v437_v56 = vld [vmem:[%s2568_s8 + $0x30] sm:$0xff]  ;;  %v440_v60 = vld [vmem:[%s2568_s8 + $0x48] sm:$0xff]  ;;  %v442_v63 = vld [vmem:[%s2568_s8 + $0x58] sm:$0xff] }
  0x30   :  { %1718 = vmatpush3.bf16.msra.mxu1 %v1715_v8  ;;  %v168_v9 = vld [vmem:[#allocation2 + $0x28] sm:$0xff]  ;;  %v174_v28 = vld [vmem:[#allocation2 + $0x58] sm:$0xff]  ;;  %v1729_v58 = vpack.c.bf16 %v438_v57, %v437_v56  ;;  %v1732_v61 = vpack.c.bf16 %v440_v60, %v439_v59  ;;  %v441_v62 = vld [vmem:[%s2568_s8 + $0x50] sm:$0xff]  ;;  %v2183_v56 = vshrl.u32 %v427_v51, 7 }
  0x31   :  { %1719 = vmatprep.subr.bf16.mxu1 %v1904_v49  ;;  %v1735_v1 = vpack.c.bf16 %v442_v63, %v441_v62  ;;  %v443_v2 = vld [vmem:[%s2568_s8 + $0x60] sm:$0xff]  ;;  %v444_v4 = vld [vmem:[%s2568_s8 + $0x68] sm:$0xff]  ;;  %v445_v6 = vld [vmem:[%s2568_s8 + $0x70] sm:$0xff] }
  0x32   :  { %1694 = vmatpush3.bf16.msra.mxu0 %v1693_v17  ;;  %v171_v24 = vld [vmem:[#allocation2 + $0x40] sm:$0xff]  ;;  %v1738_v5 = vpack.c.bf16 %v444_v4, %v443_v2  ;;  %v446_v7 = vld [vmem:[%s2568_s8 + $0x78] sm:$0xff]  ;;  %vm429_vm12 = vcmp.eq.s32.totalorder %v2183_v56, 0  ;;  %v794_v51 = vld [vmem:[%s2562_s2 + $0x1c8] sm:$0xff] }
  0x33   :  { %1696 = vmatprep.subr.bf16.mxu0 %v1695_v18  ;;  %1548 = vmatmul.mubr.msk.f32.vlgmr.msra.gmra.mrb[0].mxu1 %vm76_vm3, %v168_v9  ;;  %v1741_v10 = vpack.c.bf16 %v446_v7, %v445_v6  ;;  %v518_v13 = vld [vmem:[%s2567_s7] sm:$0xff]  ;;  %v770_v7 = vld [vmem:[%s2562_s2 + $0x108] sm:$0xff] }
  0x34   :  { %1550 = vmatprep.mubr.msk.f32.mxu1 %vm76_vm3, %v171_v24  ;;  %1721 = vmatpush3.bf16.msra.mxu1 %v1720_v48  ;;  %v785_v4 = vld [vmem:[%s2562_s2 + $0x180] sm:$0xff] }
  0x35   :  { %1722 = vmatprep.subr.bf16.mxu1 %v1904_v49  ;;  %v769_v6 = vld [vmem:[%s2562_s2 + $0x100] sm:$0xff] }
  0x36   :  { %1698 = vmatpush3.bf16.msra.mxu0 %v1697_v14 }
  0x37   :  { %1700 = vmatprep.subr.bf16.mxu0 %v1699_v25  ;;  %1551 = vmatmul.mubr.msk.f32.gmra.mrb[2].mxu1 %vm76_vm3, %v174_v28 }
  0x38   :  { %1724 = vmatpush3.bf16.msra.mxu1 %v1723_v52  ;;  %1585 = vmatprep.mubr.msk.f32.mxu1 %vm1905_vm11, %v1902_v0 }
  0x39   :  { %1725 = vmatprep.subr.bf16.mxu1 %v1904_v49 }
  0x3a   :  { %1702 = vmatpush3.bf16.msra.mxu0 %v1701_v29 }
  0x3b   :  { %1588 = vmatprep.subr.mxu0 %v1902_v0 }
  0x3c   :  { %1727 = vmatpush3.bf16.msra.mxu1 %v1726_v55 }
  0x3d   :  { %1728 = vmatprep.subr.bf16.mxu1 %v1904_v49 }
  0x40   :  { %1730 = vmatpush3.bf16.msra.mxu1 %v1729_v58 }
  0x41   :  { %1731 = vmatprep.subr.bf16.mxu1 %v1904_v49 }
  0x44   :  { %1733 = vmatpush3.bf16.msra.mxu1 %v1732_v61 }
  0x45   :  { %1734 = vmatprep.subr.bf16.mxu1 %v1904_v49 }
  0x48   :  { %1736 = vmatpush3.bf16.msra.mxu1 %v1735_v1 }
  0x49   :  { %1737 = vmatprep.subr.bf16.mxu1 %v1904_v49 }
  0x4c   :  { %1739 = vmatpush3.bf16.msra.mxu1 %v1738_v5 }
  0x4d   :  { %1740 = vmatprep.subr.bf16.mxu1 %v1904_v49 }
  0x50   :  { %1742 = vmatpush3.bf16.msra.mxu1 %v1741_v10  ;;  %v787_v10 = vld [vmem:[%s2562_s2 + $0x190] sm:$0xff] }
  0x89   :  { %v135_v30 = vpop.permute.xlu0 %134  ;;  %v137_v31 = vpop.permute.xlu1 %136 }
  0x8a   :  { %146 = vst.msk [vmem:[#allocation2 + $0x8] sm:$0xff] %vm112_vm8, %v135_v30 }
  0x8b   :  { %148 = vst.msk [vmem:[#allocation2 + $0x20] sm:$0x7f] %vm147_vm9, %v137_v31 }
  0x8d   :  { %v99_v32 = vpop.permute.xlu0 %98 }
  0x8e   :  { %v101_v33 = vpop.permute.xlu1 %100  ;;  %111 = vst.msk [vmem:[#allocation2] sm:$0xfe] %vm110_vm10, %v99_v32 }
  0x8f   :  { %113 = vst.msk [vmem:[#allocation2 + $0x18] sm:$0xff] %vm112_vm8, %v101_v33 }
  0x91   :  { %v164_v34 = vld [vmem:[#allocation2 + $0x8] sm:$0xff]  ;;  %v139_v35 = vpop.permute.xlu0 %138 }
  0x92   :  { %v103_v36 = vpop.permute.xlu1 %102  ;;  %291 = vmatprep.mubr.f32.mxu0 %v164_v34  ;;  %149 = vst.msk [vmem:[#allocation2 + $0x38] sm:$0xff] %vm112_vm8, %v139_v35  ;;  %v167_v37 = vld [vmem:[#allocation2 + $0x20] sm:$0xff] }
  0x93   :  { %114 = vst.msk [vmem:[#allocation2 + $0x30] sm:$0xfe] %vm110_vm10, %v103_v36 }
  0x95   :  { %v163_v38 = vld [vmem:[#allocation2] sm:$0xff]  ;;  %v141_v39 = vpop.permute.xlu0 %140 }
  0x96   :  { %v105_v40 = vpop.permute.xlu1 %104  ;;  %292 = vmatmul.mubr.f32.vlgmr.msra.gmra.mrb[0].mxu0 %v163_v38  ;;  %150 = vst.msk [vmem:[#allocation2 + $0x50] sm:$0x7f] %vm147_vm9, %v141_v39  ;;  %v166_v41 = vld [vmem:[#allocation2 + $0x18] sm:$0xff] }
  0x97   :  { %115 = vst.msk [vmem:[#allocation2 + $0x48] sm:$0xff] %vm112_vm8, %v105_v40  ;;  %296 = vmatprep.mubr.f32.mxu0 %v167_v37  ;;  %1589 = vmatpush3.msra.mxu0 %v518_v13  ;;  %v771_v13 = vld [vmem:[%s2562_s2 + $0x110] sm:$0xff] }
  0x99   :  { %v170_v42 = vld [vmem:[#allocation2 + $0x38] sm:$0xff] }
  0x9a   :  { %297 = vmatmul.mubr.f32.gmra.mrb[2].mxu0 %v166_v41  ;;  %v169_v43 = vld [vmem:[#allocation2 + $0x30] sm:$0xff] }
  0x9b   :  { %301 = vmatprep.mubr.f32.mxu0 %v170_v42 }
  0x9d   :  { %v173_v44 = vld [vmem:[#allocation2 + $0x50] sm:$0xff] }
  0x9e   :  { %302 = vmatmul.mubr.f32.gmra.mrb[4].mxu0 %v169_v43  ;;  %v172_v45 = vld [vmem:[#allocation2 + $0x48] sm:$0xff] }
  0x9f   :  { %306 = vmatprep.mubr.f32.mxu0 %v173_v44 }
  0xa2   :  { %307 = vmatmul.mubr.f32.gmra.mrb[6].mxu0 %v172_v45 }
  0xa3   :  { %1590 = vmatprep.mubr.msk.f32.mxu0 %vm1905_vm11, %v1902_v0 }
 0x106   :  { %v1549_v3 = vpop.f32.mrb[0].mxu1 }
 0x107   :  { %v378_v8 = vpop.f32.mrb[1].mxu1 }
 0x10a   :  { %v1552_v11 = vpop.f32.mrb[2].mxu1 }
 0x10b   :  { %v388_v12 = vpop.f32.mrb[3].mxu1 }
 0x169   :  { %v1361_v15 = vpop.f32.mrb[0].mxu0 }
 0x16a   :  { %v1362_v16 = vpop.f32.mrb[1].mxu0 }
 0x16b   :  { %v1363_v17 = vadd.f32 %v1362_v16, %v1361_v15  ;;  %v772_v15 = vld [vmem:[%s2562_s2 + $0x118] sm:$0xff]  ;;  %v753_v16 = vld [vmem:[%s2562_s2 + $0x80] sm:$0xff] }
 0x16d   :  { %v379_v18 = vadd.f32 %v1363_v17, %v378_v8  ;;  %v1364_v19 = vpop.f32.mrb[2].mxu0  ;;  %v1777_v8 = vpack.c.bf16 %v770_v7, %v769_v6  ;;  %v754_v17 = vld [vmem:[%s2562_s2 + $0x88] sm:$0xff] }
 0x16e   :  { %v1365_v20 = vpop.f32.mrb[3].mxu0  ;;  %v762_v6 = vld [vmem:[%s2562_s2 + $0xc8] sm:$0xff] }
 0x16f   :  { %v1366_v21 = vadd.f32 %v1365_v20, %v1364_v19  ;;  %v397_v14 = vmul.f32 0.01, %v379_v18  ;;  %v1743_v19 = vpack.c.bf16 %v754_v17, %v753_v16  ;;  %v737_v20 = vld [vmem:[%s2562_s2] sm:$0xff] }
 0x170   :  { %v781_v17 = vld [vmem:[%s2562_s2 + $0x160] sm:$0xff] }
 0x171   :  { %v384_v22 = vadd.f32 %v1549_v3, %v1366_v21  ;;  %v1367_v23 = vpop.f32.mrb[4].mxu0  ;;  %v2165_v30 = vmax.f32 %v379_v18, %v397_v14  ;;  %v786_v3 = vld [vmem:[%s2562_s2 + $0x188] sm:$0xff]  ;;  %v1781_v18 = vpack.c.bf16 %v772_v15, %v771_v13  ;;  %1744 = vmatprep.subr.bf16.mxu0 %v1743_v19  ;;  %v797_v13 = vld [vmem:[%s2562_s2 + $0x1e0] sm:$0xff]  ;;  %v763_v19 = vld [vmem:[%s2562_s2 + $0xd0] sm:$0xff] }
 0x172   :  { %v1368_v9 = vpop.f32.mrb[5].mxu0  ;;  %v1775_v5 = vpack.c.bf16 %v786_v3, %v785_v4  ;;  %v738_v21 = vld [vmem:[%s2562_s2 + $0x8] sm:$0xff]  ;;  %v779_v4 = vld [vmem:[%s2562_s2 + $0x150] sm:$0xff]  ;;  %v780_v3 = vld [vmem:[%s2562_s2 + $0x158] sm:$0xff] }
 0x173   :  { %v398_v24 = vmul.f32 0.01, %v384_v22  ;;  %v1369_v25 = vadd.f32 %v1368_v9, %v1367_v23  ;;  %v414_v36 = vmul.f32 %v2165_v30, %v2165_v30  ;;  %v789_v23 = vld [vmem:[%s2562_s2 + $0x1a0] sm:$0xff]  ;;  %v790_v9 = vld [vmem:[%s2562_s2 + $0x1a8] sm:$0xff]  ;;  %v1797_v7 = vpack.c.bf16 %v780_v3, %v779_v4 }
 0x174   :  { %1776 = vmatprep.subr.bf16.mxu1 %v1775_v5  ;;  %v1783_v14 = vpack.c.bf16 %v790_v9, %v789_v23  ;;  %v761_v5 = vld [vmem:[%s2562_s2 + $0xc0] sm:$0xff]  ;;  %v798_v15 = vld [vmem:[%s2562_s2 + $0x1e8] sm:$0xff]  ;;  %v747_v23 = vld [vmem:[%s2562_s2 + $0x50] sm:$0xff]  ;;  %v2400_v3 = vsub.s32 0, %v2183_v56 }
 0x175   :  { %v2163_v26 = vmax.f32 %v384_v22, %v398_v24  ;;  %v389_v27 = vadd.f32 %v1369_v25, %v388_v12  ;;  %v1370_v28 = vpop.f32.mrb[6].mxu0  ;;  %v1745_v22 = vpack.c.bf16 %v738_v21, %v737_v20  ;;  %v773_v24 = vld [vmem:[%s2562_s2 + $0x120] sm:$0xff]  ;;  %v774_v25 = vld [vmem:[%s2562_s2 + $0x128] sm:$0xff]  ;;  %v1799_v16 = vpack.c.bf16 %v798_v15, %v797_v13  ;;  %v764_v20 = vld [vmem:[%s2562_s2 + $0xd8] sm:$0xff] }
 0x176   :  { %v1371_v29 = vpop.f32.mrb[7].mxu0  ;;  %v748_v9 = vld [vmem:[%s2562_s2 + $0x58] sm:$0xff] }
 0x177   :  { %v399_v31 = vmul.f32 0.01, %v389_v27  ;;  %v1372_v32 = vadd.f32 %v1371_v29, %v1370_v28  ;;  %v415_v33 = vmul.f32 %v2163_v26, %v2163_v26  ;;  %v405_v37 = vadd.f32 %v2163_v26, %v2165_v30  ;;  %v756_v28 = vld [vmem:[%s2562_s2 + $0x98] sm:$0xff] }
 0x178   :  { %v1785_v29 = vpack.c.bf16 %v774_v25, %v773_v24  ;;  %v799_v24 = vld [vmem:[%s2562_s2 + $0x1f0] sm:$0xff]  ;;  %v800_v25 = vld [vmem:[%s2562_s2 + $0x1f8] sm:$0xff] }
 0x179   :  { %v2169_v34 = vmax.f32 %v389_v27, %v399_v31  ;;  %v394_v35 = vadd.f32 %v1552_v11, %v1372_v32  ;;  %v418_v41 = vadd.f32 %v415_v33, %v414_v36  ;;  %v788_v11 = vld [vmem:[%s2562_s2 + $0x198] sm:$0xff]  ;;  %v755_v27 = vld [vmem:[%s2562_s2 + $0x90] sm:$0xff] }
 0x17a   :  { %v1779_v12 = vpack.c.bf16 %v788_v11, %v787_v10  ;;  %v1747_v31 = vpack.c.bf16 %v756_v28, %v755_v27  ;;  %v739_v32 = vld [vmem:[%s2562_s2 + $0x10] sm:$0xff]  ;;  %v740_v33 = vld [vmem:[%s2562_s2 + $0x18] sm:$0xff]  ;;  %v745_v10 = vld [vmem:[%s2562_s2 + $0x40] sm:$0xff]  ;;  %v1803_v27 = vpack.c.bf16 %v800_v25, %v799_v24 }
 0x17b   :  { %v416_v38 = vmul.f32 %v2169_v34, %v2169_v34  ;;  %v400_v39 = vmul.f32 0.01, %v394_v35  ;;  %v406_v40 = vadd.f32 %v405_v37, %v2169_v34  ;;  %v791_v36 = vld [vmem:[%s2562_s2 + $0x1b0] sm:$0xff]  ;;  %v792_v37 = vld [vmem:[%s2562_s2 + $0x1b8] sm:$0xff]  ;;  %v746_v11 = vld [vmem:[%s2562_s2 + $0x48] sm:$0xff] }
 0x17c   :  { %v783_v28 = vld [vmem:[%s2562_s2 + $0x170] sm:$0xff] }
 0x17d   :  { %v2178_v42 = vmax.f32 %v394_v35, %v400_v39  ;;  %v419_v43 = vadd.f32 %v418_v41, %v416_v38  ;;  %v1749_v35 = vpack.c.bf16 %v740_v33, %v739_v32  ;;  %v1787_v38 = vpack.c.bf16 %v792_v37, %v791_v36  ;;  %v775_v39 = vld [vmem:[%s2562_s2 + $0x130] sm:$0xff]  ;;  %v757_v41 = vld [vmem:[%s2562_s2 + $0xa0] sm:$0xff]  ;;  %v766_v32 = vld [vmem:[%s2562_s2 + $0xe8] sm:$0xff] }
 0x17e   :  { %v749_v36 = vld [vmem:[%s2562_s2 + $0x60] sm:$0xff]  ;;  %v750_v37 = vld [vmem:[%s2562_s2 + $0x68] sm:$0xff] }
 0x17f   :  { %v407_v44 = vadd.f32 %v406_v40, %v2178_v42  ;;  %v417_v45 = vmul.f32 %v2178_v42, %v2178_v42  ;;  %v776_v40 = vld [vmem:[%s2562_s2 + $0x138] sm:$0xff] }
 0x181   :  { %v408_v46 = vrot.slane %v407_v44, 4  ;;  %v420_v47 = vadd.f32 %v419_v43, %v417_v45  ;;  %v758_v43 = vld [vmem:[%s2562_s2 + $0xa8] sm:$0xff] }
 0x182   :  { %v1751_v45 = vpack.c.bf16 %v758_v43, %v757_v41  ;;  %v751_v41 = vld [vmem:[%s2562_s2 + $0x70] sm:$0xff] }
 0x183   :  { %v409_v48 = vadd.f32 %v408_v46, %v407_v44  ;;  %v421_v50 = vrot.slane %v420_v47, 4  ;;  %v1789_v44 = vpack.c.bf16 %v776_v40, %v775_v39  ;;  %v741_v46 = vld [vmem:[%s2562_s2 + $0x20] sm:$0xff]  ;;  %v767_v39 = vld [vmem:[%s2562_s2 + $0xf0] sm:$0xff]  ;;  %v768_v40 = vld [vmem:[%s2562_s2 + $0xf8] sm:$0xff] }
 0x184   :  { %v1771_v43 = vpack.c.bf16 %v768_v40, %v767_v39 }
 0x185   :  { %v410_v52 = vrot.slane %v409_v48, 2  ;;  %v422_v53 = vadd.f32 %v421_v50, %v420_v47  ;;  %v742_v47 = vld [vmem:[%s2562_s2 + $0x28] sm:$0xff]  ;;  %v793_v50 = vld [vmem:[%s2562_s2 + $0x1c0] sm:$0xff] }
 0x187   :  { %v411_v54 = vadd.f32 %v410_v52, %v409_v48  ;;  %v423_v55 = vrot.slane %v422_v53, 2  ;;  %v1753_v48 = vpack.c.bf16 %v742_v47, %v741_v46  ;;  %v1791_v52 = vpack.c.bf16 %v794_v51, %v793_v50  ;;  %v801_v46 = vld [vmem:[%s2562_s2 + $0x200] sm:$0xff]  ;;  %v802_v47 = vld [vmem:[%s2562_s2 + $0x208] sm:$0xff] }
 0x189   :  { %v412_v57 = vrot.slane %v411_v54, 1  ;;  %v424_v58 = vadd.f32 %v423_v55, %v422_v53  ;;  %v777_v53 = vld [vmem:[%s2562_s2 + $0x140] sm:$0xff]  ;;  %v759_v55 = vld [vmem:[%s2562_s2 + $0xb0] sm:$0xff] }
 0x18b   :  { %v425_v59 = vrot.slane %v424_v58, 1  ;;  %v413_v60 = vadd.f32 %v412_v57, %v411_v54  ;;  %v778_v54 = vld [vmem:[%s2562_s2 + $0x148] sm:$0xff]  ;;  %v760_v57 = vld [vmem:[%s2562_s2 + $0xb8] sm:$0xff] }
 0x18d   :  { %v426_v61 = vadd.f32 %v425_v59, %v424_v58  ;;  %v1793_v58 = vpack.c.bf16 %v778_v54, %v777_v53  ;;  %v1755_v59 = vpack.c.bf16 %v760_v57, %v759_v55 }
 0x18f   :  { %v430_v62 = vsel %vm429_vm12, %v413_v60, %v426_v61  ;;  %v743_v60 = vld [vmem:[%s2562_s2 + $0x30] sm:$0xff]  ;;  %v744_v61 = vld [vmem:[%s2562_s2 + $0x38] sm:$0xff] }
 0x190   :  { %1586 = vmatmul.mubr.f32.vlgmr.msra.gmra.mrb[4].mxu1 %v430_v62  ;;  %v1757_v62 = vpack.c.bf16 %v744_v61, %v743_v60 }
 0x191   :  { %1778 = vmatpush3.bf16.msra.mxu1 %v1777_v8  ;;  %v1759_v8 = vpack.c.bf16 %v762_v6, %v761_v5  ;;  %v620_v6 = vld [vmem:[%s2564_s4] sm:$0x1] }
 0x192   :  { %1780 = vmatprep.subr.bf16.mxu1 %v1779_v12  ;;  %v1761_v12 = vpack.c.bf16 %v746_v11, %v745_v10 }
 0x195   :  { %1782 = vmatpush3.bf16.msra.mxu1 %v1781_v18  ;;  %v782_v18 = vld [vmem:[%s2562_s2 + $0x168] sm:$0xff] }
 0x196   :  { %1784 = vmatprep.subr.bf16.mxu1 %v1783_v14  ;;  %v1801_v21 = vpack.c.bf16 %v782_v18, %v781_v17  ;;  %v1765_v14 = vpack.c.bf16 %v748_v9, %v747_v23 }
 0x199   :  { %1786 = vmatpush3.bf16.msra.mxu1 %v1785_v29  ;;  %v784_v29 = vld [vmem:[%s2562_s2 + $0x178] sm:$0xff] }
 0x19a   :  { %1788 = vmatprep.subr.bf16.mxu1 %v1787_v38  ;;  %v1805_v33 = vpack.c.bf16 %v784_v29, %v783_v28  ;;  %v1769_v38 = vpack.c.bf16 %v750_v37, %v749_v36 }
 0x19d   :  { %1790 = vmatpush3.bf16.msra.mxu1 %v1789_v44  ;;  %v752_v44 = vld [vmem:[%s2562_s2 + $0x78] sm:$0xff] }
 0x19e   :  { %1792 = vmatprep.subr.bf16.mxu1 %v1791_v52 }
 0x1a1   :  { %1794 = vmatpush3.bf16.msra.mxu1 %v1793_v58  ;;  %v1906_v58 = vmov 1966171168  }
 0x263   :  { %v513_v63 = vpop.f32.mrb[4].mxu1 }
 0x264   :  { %v517_v1 = vmul.f32 0.001953125, %v513_v63  ;;  %v1587_v2 = vpop.f32.mrb[5].mxu1  ;;  %v795_v63 = vld [vmem:[%s2562_s2 + $0x1d0] sm:$0xff] }
 0x266   :  { %1591 = vmatmul.mubr.msk.f32.vlgmr.msra.gmra.mrb[8].mxu0 %vm519_vm13, %v517_v1  ;;  %v796_v1 = vld [vmem:[%s2562_s2 + $0x1d8] sm:$0xff] }
 0x267   :  { %1746 = vmatpush3.bf16.msra.mxu0 %v1745_v22  ;;  %v1795_v2 = vpack.c.bf16 %v796_v1, %v795_v63  ;;  %v1763_v22 = vpack.c.bf16 %v764_v20, %v763_v19 }
 0x268   :  { %1748 = vmatprep.subr.bf16.mxu0 %v1747_v31  ;;  %v765_v31 = vld [vmem:[%s2562_s2 + $0xe0] sm:$0xff] }
 0x269   :  { %1796 = vmatprep.subr.bf16.mxu1 %v1795_v2  ;;  %v599_v2 = vld [vmem:[%s2563_s3] sm:$0x1] }
 0x26a   :  { %1798 = vmatpush3.bf16.msra.mxu1 %v1797_v7 }
 0x26b   :  { %1750 = vmatpush3.bf16.msra.mxu0 %v1749_v35  ;;  %1800 = vmatprep.subr.bf16.mxu1 %v1799_v16  ;;  %v1767_v35 = vpack.c.bf16 %v766_v32, %v765_v31 }
 0x26c   :  { %1752 = vmatprep.subr.bf16.mxu0 %v1751_v45  ;;  %v1773_v45 = vpack.c.bf16 %v752_v44, %v751_v41  ;;  %v804_v44 = vld [vmem:[%s2562_s2 + $0x218] sm:$0xff] }
 0x26e   :  { %1802 = vmatpush3.bf16.msra.mxu1 %v1801_v21 }
 0x26f   :  { %1754 = vmatpush3.bf16.msra.mxu0 %v1753_v48  ;;  %1804 = vmatprep.subr.bf16.mxu1 %v1803_v27  ;;  %v2388_v48 = vpack.c.bf16 %v802_v47, %v801_v46 }
 0x270   :  { %1756 = vmatprep.subr.bf16.mxu0 %v1755_v59  ;;  %v604_v59 = vunpack.c.l.s4 %v1906_v58 }
 0x272   :  { %1806 = vmatpush3.bf16.msra.mxu1 %v1805_v33  ;;  %v605_v60 = vunpack.c.0.s8 %v604_v59 }
 0x273   :  { %1758 = vmatpush3.bf16.msra.mxu0 %v1757_v62  ;;  %1839 = vmatprep.subr.bf16.mxu1 %v1904_v49 }
 0x274   :  { %1760 = vmatprep.subr.bf16.mxu0 %v1759_v8  ;;  %v2392_v61 = vsub.s32 %v605_v60, %v2183_v56  ;;  %v809_v60 = vld [vmem:[%s2562_s2 + $0x240] sm:$0xff] }
 0x277   :  { %1762 = vmatpush3.bf16.msra.mxu0 %v1761_v12 }
 0x278   :  { %1764 = vmatprep.subr.bf16.mxu0 %v1763_v22 }
 0x27b   :  { %1766 = vmatpush3.bf16.msra.mxu0 %v1765_v14 }
 0x27c   :  { %1768 = vmatprep.subr.bf16.mxu0 %v1767_v35 }
 0x27f   :  { %1770 = vmatpush3.bf16.msra.mxu0 %v1769_v38 }
 0x280   :  { %1772 = vmatprep.subr.bf16.mxu0 %v1771_v43  ;;  %v803_v43 = vld [vmem:[%s2562_s2 + $0x210] sm:$0xff] }
 0x281   :  { %v1811_v47 = vpack.c.bf16 %v804_v44, %v803_v43 }
 0x283   :  { %1774 = vmatpush3.bf16.msra.mxu0 %v1773_v45 }
 0x284   :  { %1808 = vmatprep.subr.bf16.mxu0 %v2388_v48 }
 0x339   :  { %v589_v50 = vpop.f32.mrb[8].mxu0 }
 0x33a   :  { %v593_v51 = vmul.f32 %v589_v50, %v589_v50  ;;  %v1592_v52 = vpop.f32.mrb[9].mxu0 }
 0x33b   :  { %v806_v52 = vld [vmem:[%s2562_s2 + $0x228] sm:$0xff] }
 0x33c   :  { %v595_v53 = vrot.slane %v593_v51, 7  ;;  %v805_v51 = vld [vmem:[%s2562_s2 + $0x220] sm:$0xff] }
 0x33e   :  { %v597_v54 = vsub.f32 %v589_v50, %v595_v53  ;;  %v1815_v53 = vpack.c.bf16 %v806_v52, %v805_v51 }
 0x340   :  { %v598_v55 = vmax.f32 %v597_v54, 0.0  ;;  %v807_v54 = vld [vmem:[%s2562_s2 + $0x230] sm:$0xff] }
 0x342   :  { %v600_v57 = vadd.f32 1e-05, %v598_v55  ;;  %v808_v55 = vld [vmem:[%s2562_s2 + $0x238] sm:$0xff] }
 0x343   :  { %v1819_v58 = vpack.c.bf16 %v808_v55, %v807_v54 }
 0x344   :  { %1871 = vrsqrt.f32 %v600_v57 }
 0x34e   :  { %v1872_v62 = vpop.eup %1871 }
 0x34f   :  { %v609_v63 = vrot.slane %v1872_v62, %v2392_v61  ;;  %v810_v62 = vld [vmem:[%s2562_s2 + $0x248] sm:$0xff] }
 0x351   :  { %v610_v1 = vcombine.high %v609_v63, %v609_v63  ;;  %v1823_v63 = vpack.c.bf16 %v810_v62, %v809_v60 }
 0x353   :  { %v617_v4 = vrot.slane %v610_v1, %v2392_v61  ;;  %v811_v1 = vld [vmem:[%s2562_s2 + $0x250] sm:$0xff] }
 0x355   :  { %v619_v5 = vmul.f32 %v617_v4, %v599_v2  ;;  %v812_v2 = vld [vmem:[%s2562_s2 + $0x258] sm:$0xff] }
 0x356   :  { %v1827_v4 = vpack.c.bf16 %v812_v2, %v811_v1 }
 0x357   :  { %v621_v7 = vmul.f32 %v619_v5, %v589_v50  ;;  %v627_v8 = vrot.slane %v619_v5, %v2400_v3  ;;  %v813_v5 = vld [vmem:[%s2562_s2 + $0x260] sm:$0xff] }
 0x359   :  { %v622_v10 = vsub.f32 %v620_v6, %v621_v7  ;;  %v629_v11 = vmul.f32 %v627_v8, %v2165_v30  ;;  %v630_v12 = vmul.f32 %v627_v8, %v2163_v26  ;;  %v631_v13 = vmul.f32 %v627_v8, %v2169_v34  ;;  %v814_v6 = vld [vmem:[%s2562_s2 + $0x268] sm:$0xff] }
 0x35a   :  { %v632_v15 = vmul.f32 %v627_v8, %v2178_v42  ;;  %v1831_v7 = vpack.c.bf16 %v814_v6, %v813_v5  ;;  %v815_v8 = vld [vmem:[%s2562_s2 + $0x270] sm:$0xff] }
 0x35b   :  { %v637_v16 = vrot.slane %v622_v10, %v2400_v3  ;;  %v816_v10 = vld [vmem:[%s2562_s2 + $0x278] sm:$0xff] }
 0x35d   :  { %v639_v17 = vadd.f32 %v637_v16, %v629_v11  ;;  %v640_v18 = vadd.f32 %v637_v16, %v630_v12  ;;  %v641_v19 = vadd.f32 %v637_v16, %v631_v13  ;;  %v2411_v20 = vadd.f32 %v637_v16, %v632_v15  ;;  %v1103_v15 = vld [vmem:[%s2570_s10] sm:$0xff]  ;;  %v1104_v16 = vld [vmem:[%s2570_s10 + $0x8] sm:$0xff] }
 0x35e   :  { %v1835_v11 = vpack.c.bf16 %v816_v10, %v815_v8 }
 0x35f   :  { %v649_v21 = vrot.slane %v639_v17, 6  ;;  %v650_v22 = vrot.slane %v640_v18, 6  ;;  %v652_v23 = vrot.slane %v641_v19, 6  ;;  %v653_v30 = vrot.slane %v2411_v20, 6 }
 0x360   :  { %v665_v9 = vrot.slane %v639_v17, 7  ;;  %v666_v26 = vrot.slane %v640_v18, 7  ;;  %v668_v14 = vrot.slane %v641_v19, 7  ;;  %v669_v34 = vrot.slane %v2411_v20, 7 }
 0x361   :  { %v651_v42 = vsel %vm63_vm6, %v649_v21, %v650_v22  ;;  %v2417_v24 = vsel %vm63_vm6, %v652_v23, %v653_v30  ;;  %659 = vst [vmem:[#allocation3] sm:$0xfc] %v649_v21  ;;  %661 = vst [vmem:[#allocation3 + $0x50] sm:$0xfc] %v652_v23  ;;  %v686_v25 = vrot.slane %v639_v17, 1  ;;  %v687_v27 = vrot.slane %v640_v18, 1 }
 0x362   :  { %v667_v28 = vsel %vm91_vm5, %v665_v9, %v666_v26  ;;  %v670_v29 = vsel %vm91_vm5, %v668_v14, %v669_v34  ;;  %675 = vst [vmem:[#allocation3 + $0x8] sm:$0xfe] %v665_v9  ;;  %677 = vst [vmem:[#allocation3 + $0x58] sm:$0xfe] %v668_v14  ;;  %v689_v31 = vrot.slane %v641_v19, 1  ;;  %v690_v32 = vrot.slane %v2411_v20, 1 }
 0x363   :  { %v688_v33 = vsel %vm685_vm14, %v686_v25, %v687_v27  ;;  %697 = vst [vmem:[#allocation3 + $0x40] sm:$0x7f] %v687_v27  ;;  %v703_v35 = vrot.slane %v639_v17, 2  ;;  %v704_v36 = vrot.slane %v640_v18, 2  ;;  %v706_v37 = vrot.slane %v641_v19, 2  ;;  %v1107_v21 = vld [vmem:[%s2570_s10 + $0x20] sm:$0xff] }
 0x364   :  { %v691_v38 = vsel %vm685_vm14, %v689_v31, %v690_v32  ;;  %699 = vst [vmem:[#allocation3 + $0x90] sm:$0x7f] %v690_v32  ;;  %v707_v39 = vrot.slane %v2411_v20, 2  ;;  %966 = vmatprep.mubr.f32.mxu1 %v688_v33  ;;  %v1108_v22 = vld [vmem:[%s2570_s10 + $0x28] sm:$0xff]  ;;  %v1109_v30 = vld [vmem:[%s2570_s10 + $0x30] sm:$0xff]  ;;  %v1110_v9 = vld [vmem:[%s2570_s10 + $0x38] sm:$0xff] }
 0x365   :  { %v705_v40 = vsel %vm702_vm15, %v703_v35, %v704_v36  ;;  %714 = vst [vmem:[#allocation3 + $0x48] sm:$0x3f] %v704_v36  ;;  %967 = vmatmul.mubr.f32.vlgmr.msra.gmra.mrb[6].mxu1 %v639_v17  ;;  %v1840_v17 = vpack.c.bf16 %v1104_v16, %v1103_v15  ;;  %v1846_v23 = vpack.c.bf16 %v1108_v22, %v1107_v21  ;;  %v1111_v14 = vld [vmem:[%s2570_s10 + $0x40] sm:$0xff]  ;;  %v1112_v34 = vld [vmem:[%s2570_s10 + $0x48] sm:$0xff]  ;;  %v1114_v25 = vld [vmem:[%s2570_s10 + $0x58] sm:$0xff] }
 0x366   :  { %v708_v41 = vsel %vm702_vm15, %v706_v37, %v707_v39  ;;  %716 = vst [vmem:[#allocation3 + $0x98] sm:$0x3f] %v707_v39  ;;  %v1849_v26 = vpack.c.bf16 %v1110_v9, %v1109_v30  ;;  %v1115_v27 = vld [vmem:[%s2570_s10 + $0x60] sm:$0xff]  ;;  %v1117_v32 = vld [vmem:[%s2570_s10 + $0x70] sm:$0xff]  ;;  %v1118_v33 = vld [vmem:[%s2570_s10 + $0x78] sm:$0xff] }
 0x367   :  { %1841 = vmatpush3.bf16.msra.mxu1 %v1840_v17  ;;  %v1861_v35 = vpack.c.bf16 %v1118_v33, %v1117_v32 }
 0x368   :  { %v717_v45 = vld [vmem:[#allocation3] sm:$0xff]  ;;  %v727_v59 = vld [vmem:[#allocation3 + $0x50] sm:$0xff]  ;;  %1842 = vmatprep.subr.bf16.mxu1 %v1904_v49 }
 0x369   :  { %v718_v46 = vld [vmem:[#allocation3 + $0x8] sm:$0xff]  ;;  %v728_v57 = vld [vmem:[#allocation3 + $0x58] sm:$0xff] }
 0x36a   :  { %881 = vmatprep.mubr.f32.mxu0 %v718_v46  ;;  %v725_v50 = vld [vmem:[#allocation3 + $0x40] sm:$0xff] }
 0x36b   :  { %882 = vmatmul.mubr.f32.vlgmr.msra.gmra.mrb[10].mxu0 %v717_v45  ;;  %971 = vmatprep.mubr.f32.mxu1 %v725_v50 }
 0x36c   :  { %1810 = vmatpush3.bf16.msra.mxu0 %v2388_v48  ;;  %886 = vmatprep.mubr.f32.mxu0 %v667_v28  ;;  %v735_v48 = vld [vmem:[#allocation3 + $0x90] sm:$0xff]  ;;  %v726_v12 = vld [vmem:[#allocation3 + $0x48] sm:$0xff] }
 0x36d   :  { %1812 = vmatprep.subr.bf16.mxu0 %v1811_v47  ;;  %972 = vmatmul.mubr.f32.gmra.mrb[8].mxu1 %v640_v18  ;;  %v736_v13 = vld [vmem:[#allocation3 + $0x98] sm:$0xff]  ;;  %v1105_v18 = vld [vmem:[%s2570_s10 + $0x10] sm:$0xff] }
 0x36e   :  { %976 = vmatprep.mubr.f32.mxu1 %v691_v38 }
 0x36f   :  { %887 = vmatmul.mubr.f32.gmra.mrb[12].mxu0 %v651_v42  ;;  %v1852_v42 = vpack.c.bf16 %v1112_v34, %v1111_v14 }
 0x370   :  { %1814 = vmatpush3.bf16.msra.mxu0 %v1811_v47  ;;  %891 = vmatprep.mubr.f32.mxu0 %v728_v57 }
 0x371   :  { %1816 = vmatprep.subr.bf16.mxu0 %v1815_v53  ;;  %977 = vmatmul.mubr.f32.gmra.mrb[10].mxu1 %v641_v19  ;;  %v1106_v19 = vld [vmem:[%s2570_s10 + $0x18] sm:$0xff] }
 0x372   :  { %981 = vmatprep.mubr.f32.mxu1 %v735_v48 }
 0x373   :  { %892 = vmatmul.mubr.f32.gmra.mrb[14].mxu0 %v727_v59 }
 0x374   :  { %1818 = vmatpush3.bf16.msra.mxu0 %v1815_v53  ;;  %896 = vmatprep.mubr.f32.mxu0 %v670_v29  ;;  %v1116_v29 = vld [vmem:[%s2570_s10 + $0x68] sm:$0xff] }
 0x375   :  { %1820 = vmatprep.subr.bf16.mxu0 %v1819_v58  ;;  %982 = vmatmul.mubr.f32.gmra.mrb[12].mxu1 %v2411_v20  ;;  %v1843_v20 = vpack.c.bf16 %v1106_v19, %v1105_v18  ;;  %v1858_v31 = vpack.c.bf16 %v1116_v29, %v1115_v27 }
 0x376   :  { %1663 = vmatprep.mubr.msk.f32.mxu1 %vm1905_vm11, %v1902_v0 }
 0x377   :  { %897 = vmatmul.mubr.f32.gmra.mrb[16].mxu0 %v2417_v24  ;;  %1844 = vmatpush3.bf16.msra.mxu1 %v1843_v20  ;;  %v1113_v24 = vld [vmem:[%s2570_s10 + $0x50] sm:$0xff] }
 0x378   :  { %1822 = vmatpush3.bf16.msra.mxu0 %v1819_v58  ;;  %1625 = vmatprep.mubr.f32.mxu0 %v705_v40  ;;  %v1855_v28 = vpack.c.bf16 %v1114_v25, %v1113_v24 }
 0x379   :  { %1824 = vmatprep.subr.bf16.mxu0 %v1823_v63  ;;  %1845 = vmatprep.subr.bf16.mxu1 %v1904_v49 }
 0x37b   :  { %1847 = vmatpush3.bf16.msra.mxu1 %v1846_v23 }
 0x37c   :  { %1826 = vmatpush3.bf16.msra.mxu0 %v1823_v63  ;;  %1848 = vmatprep.subr.bf16.mxu1 %v1904_v49 }
 0x37d   :  { %1828 = vmatprep.subr.bf16.mxu0 %v1827_v4 }
 0x37f   :  { %1850 = vmatpush3.bf16.msra.mxu1 %v1849_v26 }
 0x380   :  { %1830 = vmatpush3.bf16.msra.mxu0 %v1827_v4  ;;  %1851 = vmatprep.subr.bf16.mxu1 %v1904_v49 }
 0x381   :  { %1832 = vmatprep.subr.bf16.mxu0 %v1831_v7 }
 0x383   :  { %1853 = vmatpush3.bf16.msra.mxu1 %v1852_v42 }
 0x384   :  { %1834 = vmatpush3.bf16.msra.mxu0 %v1831_v7  ;;  %1854 = vmatprep.subr.bf16.mxu1 %v1904_v49 }
 0x385   :  { %1836 = vmatprep.subr.bf16.mxu0 %v1835_v11 }
 0x387   :  { %1856 = vmatpush3.bf16.msra.mxu1 %v1855_v28 }
 0x388   :  { %1838 = vmatpush3.bf16.msra.mxu0 %v1835_v11  ;;  %1857 = vmatprep.subr.bf16.mxu1 %v1904_v49 }
 0x38b   :  { %1626 = vmatmul.mubr.f32.vlgmr.msra.gmra.mrb[18].mxu0 %v726_v12  ;;  %1859 = vmatpush3.bf16.msra.mxu1 %v1858_v31 }
 0x38c   :  { %1628 = vmatprep.mubr.f32.mxu0 %v708_v41  ;;  %1860 = vmatprep.subr.bf16.mxu1 %v1904_v49 }
 0x38f   :  { %1629 = vmatmul.mubr.f32.gmra.mrb[20].mxu0 %v736_v13  ;;  %1862 = vmatpush3.bf16.msra.mxu1 %v1861_v35 }
 0x390   :  { %1666 = vmatprep.subr.mxu1 %v1902_v0 }
 0x438   :  { %v1480_v36 = vpop.f32.mrb[6].mxu1 }
 0x439   :  { %v1481_v37 = vpop.f32.mrb[7].mxu1 }
 0x43a   :  { %v1482_v38 = vadd.f32 %v1481_v37, %v1480_v36 }
 0x43e   :  { %v1436_v39 = vpop.f32.mrb[10].mxu0 }
 0x43f   :  { %v1437_v40 = vpop.f32.mrb[11].mxu0 }
 0x440   :  { %v1438_v41 = vadd.f32 %v1437_v40, %v1436_v39  ;;  %v1483_v43 = vpop.f32.mrb[8].mxu1 }
 0x441   :  { %v1484_v44 = vpop.f32.mrb[9].mxu1 }
 0x442   :  { %v1439_v45 = vpop.f32.mrb[12].mxu0  ;;  %v1485_v46 = vadd.f32 %v1484_v44, %v1483_v43  ;;  %v969_v47 = vadd.f32 %v1482_v38, %v1438_v41  ;;  %v1190_v43 = vld [vmem:[%s2569_s9] sm:$0xff] }
 0x443   :  { %v1440_v50 = vpop.f32.mrb[13].mxu0 }
 0x444   :  { %v1441_v51 = vadd.f32 %v1440_v50, %v1439_v45  ;;  %v1486_v52 = vpop.f32.mrb[10].mxu1 }
 0x445   :  { %v1487_v53 = vpop.f32.mrb[11].mxu1 }
 0x446   :  { %v1442_v54 = vpop.f32.mrb[14].mxu0  ;;  %v1488_v49 = vadd.f32 %v1487_v53, %v1486_v52  ;;  %v974_v55 = vadd.f32 %v1485_v46, %v1441_v51 }
 0x447   :  { %v1443_v57 = vpop.f32.mrb[15].mxu0 }
 0x448   :  { %v1444_v48 = vadd.f32 %v1443_v57, %v1442_v54  ;;  %v1489_v58 = vpop.f32.mrb[12].mxu1 }
 0x449   :  { %v1490_v59 = vpop.f32.mrb[13].mxu1 }
 0x44a   :  { %v1445_v60 = vpop.f32.mrb[16].mxu0  ;;  %v1491_v62 = vadd.f32 %v1490_v59, %v1489_v58  ;;  %v979_v63 = vadd.f32 %v1488_v49, %v1444_v48 }
 0x44b   :  { %v1446_v1 = vpop.f32.mrb[17].mxu0 }
 0x44c   :  { %v1447_v2 = vadd.f32 %v1446_v1, %v1445_v60  ;;  %v1291_v60 = vld [vmem:[%s2566_s6] sm:$0x1] }
 0x44e   :  { %v984_v4 = vadd.f32 %v1491_v62, %v1447_v2 }
 0x45e   :  { %v1627_v5 = vpop.f32.mrb[18].mxu0 }
 0x45f   :  { %v1059_v6 = vadd.f32 %v1627_v5, %v974_v55  ;;  %v1053_v7 = vpop.f32.mrb[19].mxu0 }
 0x460   :  { %v1054_v8 = vadd.f32 %v1053_v7, %v969_v47 }
 0x461   :  { %v1073_v10 = vmul.f32 0.01, %v1059_v6 }
 0x462   :  { %v1072_v11 = vmul.f32 0.01, %v1054_v8  ;;  %v1630_v12 = vpop.f32.mrb[20].mxu0 }
 0x463   :  { %v1077_v13 = vmax.f32 %v1059_v6, %v1073_v10  ;;  %v1069_v15 = vadd.f32 %v1630_v12, %v984_v4  ;;  %v1063_v16 = vpop.f32.mrb[21].mxu0 }
 0x464   :  { %v1076_v17 = vmax.f32 %v1054_v8, %v1072_v11  ;;  %v1064_v18 = vadd.f32 %v1063_v16, %v979_v63 }
 0x465   :  { %v1075_v19 = vmul.f32 0.01, %v1069_v15  ;;  %v1090_v20 = vmul.f32 %v1077_v13, %v1077_v13 }
 0x466   :  { %v1089_v21 = vmul.f32 %v1076_v17, %v1076_v17  ;;  %v1074_v22 = vmul.f32 0.01, %v1064_v18  ;;  %v1080_v23 = vadd.f32 %v1077_v13, %v1076_v17 }
 0x467   :  { %v1079_v30 = vmax.f32 %v1069_v15, %v1075_v19 }
 0x468   :  { %v1078_v9 = vmax.f32 %v1064_v18, %v1074_v22  ;;  %v1093_v26 = vadd.f32 %v1090_v20, %v1089_v21 }
 0x469   :  { %v1092_v42 = vmul.f32 %v1079_v30, %v1079_v30 }
 0x46a   :  { %v1081_v14 = vadd.f32 %v1080_v23, %v1078_v9  ;;  %v1091_v34 = vmul.f32 %v1078_v9, %v1078_v9 }
 0x46c   :  { %v1082_v24 = vadd.f32 %v1081_v14, %v1079_v30  ;;  %v1094_v25 = vadd.f32 %v1093_v26, %v1091_v34 }
 0x46e   :  { %v1083_v27 = vrot.slane %v1082_v24, 4  ;;  %v1095_v28 = vadd.f32 %v1094_v25, %v1092_v42 }
 0x470   :  { %v1084_v29 = vadd.f32 %v1083_v27, %v1082_v24  ;;  %v1096_v31 = vrot.slane %v1095_v28, 4 }
 0x472   :  { %v1085_v32 = vrot.slane %v1084_v29, 2  ;;  %v1097_v33 = vadd.f32 %v1096_v31, %v1095_v28 }
 0x474   :  { %v1086_v35 = vadd.f32 %v1085_v32, %v1084_v29  ;;  %v1098_v36 = vrot.slane %v1097_v33, 2 }
 0x476   :  { %v1087_v37 = vrot.slane %v1086_v35, 1  ;;  %v1099_v38 = vadd.f32 %v1098_v36, %v1097_v33 }
 0x478   :  { %v1100_v39 = vrot.slane %v1099_v38, 1  ;;  %v1088_v40 = vadd.f32 %v1087_v37, %v1086_v35 }
 0x47a   :  { %v1101_v41 = vadd.f32 %v1100_v39, %v1099_v38 }
 0x47c   :  { %v1102_v44 = vsel %vm429_vm12, %v1088_v40, %v1101_v41 }
 0x47d   :  { %1664 = vmatmul.mubr.f32.vlgmr.msra.gmra.mrb[14].mxu1 %v1102_v44 }
 0x47e   :  { %1667 = vmatpush3.msra.mxu1 %v1190_v43  ;;  %1668 = vmatprep.mubr.msk.f32.mxu1 %vm1905_vm11, %v1902_v0  ;;  %v1270_v0 = vld [vmem:[%s2565_s5] sm:$0x1] }
 0x550   :  { %v1185_v45 = vpop.f32.mrb[14].mxu1 }
 0x551   :  { %v1189_v46 = vmul.f32 0.001953125, %v1185_v45  ;;  %v1665_v47 = vpop.f32.mrb[15].mxu1 }
 0x553   :  { %1669 = vmatmul.mubr.msk.f32.vlgmr.msra.gmra.mrb[16].mxu1 %vm519_vm13, %v1189_v46 }
 0x626   :  { %v1260_v50 = vpop.f32.mrb[16].mxu1 }
 0x627   :  { %v1264_v51 = vmul.f32 %v1260_v50, %v1260_v50  ;;  %v1670_v52 = vpop.f32.mrb[17].mxu1 }
 0x629   :  { %v1266_v53 = vrot.slane %v1264_v51, 7 }
 0x62b   :  { %v1268_v54 = vsub.f32 %v1260_v50, %v1266_v53 }
 0x62d   :  { %v1269_v49 = vmax.f32 %v1268_v54, 0.0 }
 0x62f   :  { %v1271_v55 = vadd.f32 1e-05, %v1269_v49 }
 0x631   :  { %1873 = vrsqrt.f32 %v1271_v55 }
 0x63b   :  { %v1874_v56 = vpop.eup %1873 }
 0x63c   :  { %v1280_v57 = vrot.slane %v1874_v56, %v2392_v61 }
 0x63e   :  { %v1281_v48 = vcombine.high %v1280_v57, %v1280_v57 }
 0x640   :  { %v1288_v58 = vrot.slane %v1281_v48, %v2392_v61 }
 0x642   :  { %v1290_v59 = vmul.f32 %v1288_v58, %v1270_v0 }
 0x644   :  { %v1292_v62 = vmul.f32 %v1290_v59, %v1260_v50  ;;  %v1298_v63 = vrot.slane %v1290_v59, %v2400_v3 }
 0x646   :  { %v1293_v1 = vsub.f32 %v1291_v60, %v1292_v62  ;;  %v1300_v2 = vmul.f32 %v1298_v63, %v1076_v17  ;;  %v1301_v4 = vmul.f32 %v1298_v63, %v1077_v13  ;;  %v1302_v5 = vmul.f32 %v1298_v63, %v1078_v9 }
 0x647   :  { %v1303_v6 = vmul.f32 %v1298_v63, %v1079_v30 }
 0x648   :  { %v1308_v7 = vrot.slane %v1293_v1, %v2400_v3 }
 0x64a   :  { %v1310_v8 = vadd.f32 %v1308_v7, %v1300_v2  ;;  %v1311_v10 = vadd.f32 %v1308_v7, %v1301_v4  ;;  %v1312_v11 = vadd.f32 %v1308_v7, %v1302_v5  ;;  %v1313_v12 = vadd.f32 %v1308_v7, %v1303_v6 }
 0x64c   :  { %1314 = vst [vmem:[%s2571_s11] sm:$0xff] %v1310_v8  ;;  %1315 = vst [vmem:[%s2571_s11 + $0x8] sm:$0xff] %v1311_v10 }
 0x64d   :  { %1316 = vst [vmem:[%s2571_s11 + $0x10] sm:$0xff] %v1312_v11  ;;  %1317 = vst [vmem:[%s2571_s11 + $0x18] sm:$0xff] %v1313_v12 }
 0x64e   :  { %1322 = vsyncpa [#allocation5], 1 }

</bundles_post_ra>
